<compile_context>
chip_gen: v5e
topology: v5e:2x2
jax: 0.10.0
libtpu: 0.0.40
codegen_flags: <defaults>
</compile_context>

<pallas_src>
import functools

import jax
import jax.numpy as jnp
from jax.experimental import pallas as pl
from jax.experimental.pallas import tpu as pltpu


def _round_up(x, m):
    return (x + m - 1) // m * m


# ----------------------------- Pallas kernel ---------------------------------

def _conv_mm_kernel(a_ref, b_ref, o_ref, acc_ref, *, act):
    """Tiled matmul, f32 accumulator; activation + store only on the final K step."""
    k = pl.program_id(2)

    @pl.when(k == 0)
    def _():
        acc_ref[...] = jnp.zeros_like(acc_ref)

    acc_ref[...] += jnp.dot(a_ref[...], b_ref[...],
                            preferred_element_type=jnp.float32)

    # Gate the output write (frees the vst slot on intermediate K steps) and fuse the
    # layer activation here instead of launching a separate elementwise kernel.
    @pl.when(k == pl.num_programs(2) - 1)
    def _():
        y = acc_ref[...]
        if act == "leaky_relu":            # LeakyReLU(0.2)
            y = jnp.where(y >= 0, y, 0.2 * y)
        elif act == "sigmoid":
            y = 1.0 / (1.0 + jnp.exp(-y))
        o_ref[...] = y.astype(o_ref.dtype)


def pallas_matmul_act(a, b, act="none"):
    """(M,K) @ (K,N) on the MXU (bf16 operands, f32 accumulation), activation fused
    into the epilogue. Tiling adapts to the layer shape."""
    M, K = a.shape
    K2, N = b.shape
    assert K == K2

    # --- K tiling: do NOT pad K=64 layers up to 128; cap reduction tiles at 512. ---
    if K <= 512:
        Kp = _round_up(K, 16) if K < 128 else _round_up(K, 128)
        tk = Kp
    else:
        tk = 512
        Kp = _round_up(K, tk)

    # --- N tiling: pad cout to a lane-dense 128 so output stores are unmasked. ---
    tn = 128
    Np = _round_up(N, tn)

    # --- M tiling: one full-extent tile up to 512 rows (fewer grid steps), else 512. ---
    Mp = _round_up(M, 8)
    if Mp <= 512:
        tm = Mp
    else:
        tm = 512
        Mp = _round_up(M, tm)

    # bf16 operands (native MXU dtype on v5e/v6e/v7x); accumulation stays f32 in-kernel.
    a_p = jnp.pad(a, ((0, Mp - M), (0, Kp - K))).astype(jnp.bfloat16)
    b_p = jnp.pad(b, ((0, Kp - K), (0, Np - N))).astype(jnp.bfloat16)

    out = pl.pallas_call(
        functools.partial(_conv_mm_kernel, act=act),
        out_shape=jax.ShapeDtypeStruct((Mp, Np), jnp.float32),
        grid_spec=pltpu.PrefetchScalarGridSpec(
            num_scalar_prefetch=0,
            grid=(Mp // tm, Np // tn, Kp // tk),
            in_specs=[pl.BlockSpec((tm, tk), lambda i, j, k: (i, k)),
                      pl.BlockSpec((tk, tn), lambda i, j, k: (k, j))],
            out_specs=pl.BlockSpec((tm, tn), lambda i, j, k: (i, j)),
            scratch_shapes=[pltpu.VMEM((tm, tn), jnp.float32)]),
        compiler_params=pltpu.CompilerParams(
            dimension_semantics=("parallel", "parallel", "arbitrary")),
    )(a_p, b_p)
    return out[:M, :N]


# --------------------------- conv lowering (glue) ----------------------------

def _im2col(x_nhwc, kh, kw, stride, pad):
    N, H, W, C = x_nhwc.shape
    xp = jnp.pad(x_nhwc, ((0, 0), (pad, pad), (pad, pad), (0, 0)))
    Ho = (H + 2 * pad - kh) // stride + 1
    Wo = (W + 2 * pad - kw) // stride + 1
    cols = []
    for i in range(kh):
        for j in range(kw):
            cols.append(xp[:, i:i + stride * Ho:stride, j:j + stride * Wo:stride, :])
    patches = jnp.concatenate(cols, axis=-1)          # (N,Ho,Wo, kh*kw*C), (i,j,c) order
    # TODO(synk): fold the kh*kw tap loop into the matmul grid (shifted-window
    # BlockSpecs) so the kh*kw-inflated patch tensor is never materialized in HBM.
    return patches.reshape(N * Ho * Wo, kh * kw * C), (N, Ho, Wo)


def conv2d(x_nhwc, w_oihw, stride, pad, act="none"):
    """PyTorch Conv2d(k=4, stride, padding, bias=False) + fused activation epilogue."""
    cout, cin, kh, kw = w_oihw.shape
    a, (N, Ho, Wo) = _im2col(x_nhwc, kh, kw, stride=stride, pad=pad)
    wmat = jnp.transpose(w_oihw, (2, 3, 1, 0)).reshape(kh * kw * cin, cout)
    y = pallas_matmul_act(a, wmat, act=act)
    return y.reshape(N, Ho, Wo, cout)


# ----------------------------- weights / model --------------------------------

def _spectral_normalize(w_oihw, key, n_iters=1):
    """torch.nn.utils.spectral_norm: divide weight by its largest singular value,
    estimated via power iteration on the (cout, cin*kh*kw) matrix."""
    cout = w_oihw.shape[0]
    wmat = w_oihw.reshape(cout, -1)
    u = jax.random.normal(key, (cout,), jnp.float32)
    u = u / (jnp.linalg.norm(u) + 1e-12)
    v = wmat.T @ u
    for _ in range(n_iters):
        v = wmat.T @ u
        v = v / (jnp.linalg.norm(v) + 1e-12)
        u = wmat @ v
        u = u / (jnp.linalg.norm(u) + 1e-12)
    sigma = u @ (wmat @ v)
    return w_oihw / sigma


def build_D(key, nc, nf):
    keys = jax.random.split(key, 8)

    def _w(k, cout, cin):
        return 0.05 * jax.random.normal(k, (cout, cin, 4, 4), jnp.float32)

    w1 = _spectral_normalize(_w(keys[0], nf, nc), keys[1])           # spectral_norm conv (s2)
    w2 = _w(keys[2], nf * 2, nf)                                     # layer1 conv (s2)
    w3 = _w(keys[3], nf * 4, nf * 2)                                 # layer2 conv (s2)
    w4 = _spectral_normalize(_w(keys[4], nf * 8, nf * 4), keys[5])   # spectral_norm conv (s1)
    w5 = _w(keys[6], 1, nf * 8)                                      # final conv (s1)

    def forward(x_nchw):
        x = jnp.transpose(x_nchw, (0, 2, 3, 1))                      # NCHW -> NHWC
        # PyTorch layer order: conv1 -> [lrelu,conv2] -> [lrelu,conv3] -> lrelu -> conv4
        #                      -> lrelu -> conv5 -> sigmoid
        # i.e. sigmoid(conv5(lrelu(conv4(lrelu(conv3(lrelu(conv2(lrelu(conv1(x)))))))))),
        # so each conv below fuses the activation that immediately follows it.
        h = conv2d(x, w1, stride=2, pad=1, act="leaky_relu")
        h = conv2d(h, w2, stride=2, pad=1, act="leaky_relu")
        h = conv2d(h, w3, stride=2, pad=1, act="leaky_relu")
        h = conv2d(h, w4, stride=1, pad=1, act="leaky_relu")
        h = conv2d(h, w5, stride=1, pad=1, act="sigmoid")
        return jnp.transpose(h, (0, 3, 1, 2))                        # NHWC -> NCHW

    return forward


# ----------------------------------- main ------------------------------------

if __name__ == "__main__":
    key = jax.random.PRNGKey(0)
    pkey, xkey = jax.random.split(key)

    nc, nf = 4, 8
    N, H, W = 2, 32, 32          # 32 -> 16 -> 8 -> 4 -> 3 -> 2 (PatchGAN output 2x2)

    forward = build_D(pkey, nc, nf)
    x = jax.random.normal(xkey, (N, nc, H, W), jnp.float32)

    y = jax.jit(forward)(x)
    jax.block_until_ready(y)
    assert y.shape == (N, 1, H // 8 - 2, W // 8 - 2), y.shape
    assert bool(jnp.all(jnp.isfinite(y)))
    assert bool(jnp.all((y >= 0.0) & (y <= 1.0)))    # sigmoid output range
    print("KERNEL_OK")
</pallas_src>

<mosaic_0001>
module attributes {stable_mosaic.version = 11 : i64} {
  func.func @_conv_mm_kernel(%arg0: i32, %arg1: i32, %arg2: i32, %arg3: memref<512x64xbf16, #tpu.memory_space<vmem>>, %arg4: memref<64x128xbf16, #tpu.memory_space<vmem>>, %arg5: memref<512x128xf32, #tpu.memory_space<vmem>>, %arg6: memref<512x128xf32, #tpu.memory_space<vmem>>) attributes {dimension_semantics = [#tpu.dimension_semantics<parallel>, #tpu.dimension_semantics<parallel>, #tpu.dimension_semantics<arbitrary>], iteration_bounds = array<i64: 1, 1, 1>, scalar_prefetch = 0 : i64, scratch_operands = 1 : i64, tpu.core_type = #tpu.core_type<tc>, window_params = [{transform_indices = @transform_0, window_bounds = array<i64: 512, 64>}, {transform_indices = @transform_1, window_bounds = array<i64: 64, 128>}, {transform_indices = @transform_2, window_bounds = array<i64: 512, 128>}]} {
    %c0_i32 = arith.constant 0 : i32
    %0 = arith.cmpi eq, %arg2, %c0_i32 : i32
    %1 = arith.extui %0 : i1 to i32
    %c0_i32_0 = arith.constant 0 : i32
    %2 = arith.cmpi ne, %1, %c0_i32_0 : i32
    scf.if %2 {
      %cst_10 = arith.constant 0.000000e+00 : f32
      %12 = vector.broadcast %cst_10 : f32 to vector<512x128xf32>
      %c0_11 = arith.constant 0 : index
      %c0_12 = arith.constant 0 : index
      %13 = vector.load %arg6[%c0_11, %c0_12] : memref<512x128xf32, #tpu.memory_space<vmem>>, vector<512x128xf32>
      tpu.vector_store %arg6[%c0_11, %c0_12], %12 {strides = array<i32>} : memref<512x128xf32, #tpu.memory_space<vmem>>, vector<512x128xf32>,
    } else {
    }
    %c0 = arith.constant 0 : index
    %c0_1 = arith.constant 0 : index
    %3 = vector.load %arg6[%c0, %c0_1] : memref<512x128xf32, #tpu.memory_space<vmem>>, vector<512x128xf32>
    %c0_2 = arith.constant 0 : index
    %c0_3 = arith.constant 0 : index
    %4 = vector.load %arg3[%c0_2, %c0_3] : memref<512x64xbf16, #tpu.memory_space<vmem>>, vector<512x64xbf16>
    %c0_4 = arith.constant 0 : index
    %c0_5 = arith.constant 0 : index
    %5 = vector.load %arg4[%c0_4, %c0_5] : memref<64x128xbf16, #tpu.memory_space<vmem>>, vector<64x128xbf16>
    %cst = arith.constant dense<0.000000e+00> : vector<512x128xf32>
    %6 = tpu.matmul %4, %5, %cst {dimension_numbers = #tpu.dot_dimension_numbers<[1], [0], [0], [1], [0, 0, 1, 1], [], []>} : vector<512x64xbf16>, vector<64x128xbf16>, vector<512x128xf32> -> vector<512x128xf32>
    %7 = arith.addf %3, %6 : vector<512x128xf32>
    %c0_6 = arith.constant 0 : index
    %c0_7 = arith.constant 0 : index
    %8 = vector.load %arg6[%c0_6, %c0_7] : memref<512x128xf32, #tpu.memory_space<vmem>>, vector<512x128xf32>
    tpu.vector_store %arg6[%c0_6, %c0_7], %7 {strides = array<i32>} : memref<512x128xf32, #tpu.memory_space<vmem>>, vector<512x128xf32>,
    %c0_i32_8 = arith.constant 0 : i32
    %9 = arith.cmpi eq, %arg2, %c0_i32_8 : i32
    %10 = arith.extui %9 : i1 to i32
    %c0_i32_9 = arith.constant 0 : i32
    %11 = arith.cmpi ne, %10, %c0_i32_9 : i32
    scf.if %11 {
      %c0_10 = arith.constant 0 : index
      %c0_11 = arith.constant 0 : index
      %12 = vector.load %arg6[%c0_10, %c0_11] : memref<512x128xf32, #tpu.memory_space<vmem>>, vector<512x128xf32>
      %cst_12 = arith.constant 0.000000e+00 : f32
      %13 = vector.broadcast %cst_12 : f32 to vector<512x128xf32>
      %14 = arith.cmpf oge, %12, %13 : vector<512x128xf32>
      %cst_13 = arith.constant 2.000000e-01 : f32
      %15 = vector.broadcast %cst_13 : f32 to vector<512x128xf32>
      %16 = arith.mulf %15, %12 : vector<512x128xf32>
      %17 = arith.select %14, %12, %16 : vector<512x128xi1>, vector<512x128xf32>
      %c0_14 = arith.constant 0 : index
      %c0_15 = arith.constant 0 : index
      %18 = vector.load %arg5[%c0_14, %c0_15] : memref<512x128xf32, #tpu.memory_space<vmem>>, vector<512x128xf32>
      tpu.vector_store %arg5[%c0_14, %c0_15], %17 {strides = array<i32>} : memref<512x128xf32, #tpu.memory_space<vmem>>, vector<512x128xf32>,
    } else {
    }
    return
  }
  func.func @transform_0(%arg0: i32, %arg1: i32, %arg2: i32) -> (i32, i32) {
    %c0_i32 = arith.constant 0 : i32
    return %arg0, %arg2 : i32, i32
  }
  func.func @transform_1(%arg0: i32, %arg1: i32, %arg2: i32) -> (i32, i32) {
    %c0_i32 = arith.constant 0 : i32
    return %arg2, %arg1 : i32, i32
  }
  func.func @transform_2(%arg0: i32, %arg1: i32, %arg2: i32) -> (i32, i32) {
    %c0_i32 = arith.constant 0 : i32
    return %arg0, %arg1 : i32, i32
  }
}

module attributes {stable_mosaic.version = 11 : i64} {
  func.func @_conv_mm_kernel(%arg0: i32, %arg1: i32, %arg2: i32, %arg3: memref<128x128xbf16, #tpu.memory_space<vmem>>, %arg4: memref<128x128xbf16, #tpu.memory_space<vmem>>, %arg5: memref<128x128xf32, #tpu.memory_space<vmem>>, %arg6: memref<128x128xf32, #tpu.memory_space<vmem>>) attributes {dimension_semantics = [#tpu.dimension_semantics<parallel>, #tpu.dimension_semantics<parallel>, #tpu.dimension_semantics<arbitrary>], iteration_bounds = array<i64: 1, 1, 1>, scalar_prefetch = 0 : i64, scratch_operands = 1 : i64, tpu.core_type = #tpu.core_type<tc>, window_params = [{transform_indices = @transform_0, window_bounds = array<i64: 128, 128>}, {transform_indices = @transform_1, window_bounds = array<i64: 128, 128>}, {transform_indices = @transform_2, window_bounds = array<i64: 128, 128>}]} {
    %c0_i32 = arith.constant 0 : i32
    %0 = arith.cmpi eq, %arg2, %c0_i32 : i32
    %1 = arith.extui %0 : i1 to i32
    %c0_i32_0 = arith.constant 0 : i32
    %2 = arith.cmpi ne, %1, %c0_i32_0 : i32
    scf.if %2 {
      %cst_10 = arith.constant 0.000000e+00 : f32
      %12 = vector.broadcast %cst_10 : f32 to vector<128x128xf32>
      %c0_11 = arith.constant 0 : index
      %c0_12 = arith.constant 0 : index
      %13 = vector.load %arg6[%c0_11, %c0_12] : memref<128x128xf32, #tpu.memory_space<vmem>>, vector<128x128xf32>
      tpu.vector_store %arg6[%c0_11, %c0_12], %12 {strides = array<i32>} : memref<128x128xf32, #tpu.memory_space<vmem>>, vector<128x128xf32>,
    } else {
    }
    %c0 = arith.constant 0 : index
    %c0_1 = arith.constant 0 : index
    %3 = vector.load %arg6[%c0, %c0_1] : memref<128x128xf32, #tpu.memory_space<vmem>>, vector<128x128xf32>
    %c0_2 = arith.constant 0 : index
    %c0_3 = arith.constant 0 : index
    %4 = vector.load %arg3[%c0_2, %c0_3] : memref<128x128xbf16, #tpu.memory_space<vmem>>, vector<128x128xbf16>
    %c0_4 = arith.constant 0 : index
    %c0_5 = arith.constant 0 : index
    %5 = vector.load %arg4[%c0_4, %c0_5] : memref<128x128xbf16, #tpu.memory_space<vmem>>, vector<128x128xbf16>
    %cst = arith.constant dense<0.000000e+00> : vector<128x128xf32>
    %6 = tpu.matmul %4, %5, %cst {dimension_numbers = #tpu.dot_dimension_numbers<[1], [0], [0], [1], [0, 0, 1, 1], [], []>} : vector<128x128xbf16>, vector<128x128xbf16>, vector<128x128xf32> -> vector<128x128xf32>
    %7 = arith.addf %3, %6 : vector<128x128xf32>
    %c0_6 = arith.constant 0 : index
    %c0_7 = arith.constant 0 : index
    %8 = vector.load %arg6[%c0_6, %c0_7] : memref<128x128xf32, #tpu.memory_space<vmem>>, vector<128x128xf32>
    tpu.vector_store %arg6[%c0_6, %c0_7], %7 {strides = array<i32>} : memref<128x128xf32, #tpu.memory_space<vmem>>, vector<128x128xf32>,
    %c0_i32_8 = arith.constant 0 : i32
    %9 = arith.cmpi eq, %arg2, %c0_i32_8 : i32
    %10 = arith.extui %9 : i1 to i32
    %c0_i32_9 = arith.constant 0 : i32
    %11 = arith.cmpi ne, %10, %c0_i32_9 : i32
    scf.if %11 {
      %c0_10 = arith.constant 0 : index
      %c0_11 = arith.constant 0 : index
      %12 = vector.load %arg6[%c0_10, %c0_11] : memref<128x128xf32, #tpu.memory_space<vmem>>, vector<128x128xf32>
      %cst_12 = arith.constant 0.000000e+00 : f32
      %13 = vector.broadcast %cst_12 : f32 to vector<128x128xf32>
      %14 = arith.cmpf oge, %12, %13 : vector<128x128xf32>
      %cst_13 = arith.constant 2.000000e-01 : f32
      %15 = vector.broadcast %cst_13 : f32 to vector<128x128xf32>
      %16 = arith.mulf %15, %12 : vector<128x128xf32>
      %17 = arith.select %14, %12, %16 : vector<128x128xi1>, vector<128x128xf32>
      %c0_14 = arith.constant 0 : index
      %c0_15 = arith.constant 0 : index
      %18 = vector.load %arg5[%c0_14, %c0_15] : memref<128x128xf32, #tpu.memory_space<vmem>>, vector<128x128xf32>
      tpu.vector_store %arg5[%c0_14, %c0_15], %17 {strides = array<i32>} : memref<128x128xf32, #tpu.memory_space<vmem>>, vector<128x128xf32>,
    } else {
    }
    return
  }
  func.func @transform_0(%arg0: i32, %arg1: i32, %arg2: i32) -> (i32, i32) {
    %c0_i32 = arith.constant 0 : i32
    return %arg0, %arg2 : i32, i32
  }
  func.func @transform_1(%arg0: i32, %arg1: i32, %arg2: i32) -> (i32, i32) {
    %c0_i32 = arith.constant 0 : i32
    return %arg2, %arg1 : i32, i32
  }
  func.func @transform_2(%arg0: i32, %arg1: i32, %arg2: i32) -> (i32, i32) {
    %c0_i32 = arith.constant 0 : i32
    return %arg0, %arg1 : i32, i32
  }
}

module attributes {stable_mosaic.version = 11 : i64} {
  func.func @_conv_mm_kernel(%arg0: i32, %arg1: i32, %arg2: i32, %arg3: memref<32x256xbf16, #tpu.memory_space<vmem>>, %arg4: memref<256x128xbf16, #tpu.memory_space<vmem>>, %arg5: memref<32x128xf32, #tpu.memory_space<vmem>>, %arg6: memref<32x128xf32, #tpu.memory_space<vmem>>) attributes {dimension_semantics = [#tpu.dimension_semantics<parallel>, #tpu.dimension_semantics<parallel>, #tpu.dimension_semantics<arbitrary>], iteration_bounds = array<i64: 1, 1, 1>, scalar_prefetch = 0 : i64, scratch_operands = 1 : i64, tpu.core_type = #tpu.core_type<tc>, window_params = [{transform_indices = @transform_0, window_bounds = array<i64: 32, 256>}, {transform_indices = @transform_1, window_bounds = array<i64: 256, 128>}, {transform_indices = @transform_2, window_bounds = array<i64: 32, 128>}]} {
    %c0_i32 = arith.constant 0 : i32
    %0 = arith.cmpi eq, %arg2, %c0_i32 : i32
    %1 = arith.extui %0 : i1 to i32
    %c0_i32_0 = arith.constant 0 : i32
    %2 = arith.cmpi ne, %1, %c0_i32_0 : i32
    scf.if %2 {
      %cst_10 = arith.constant 0.000000e+00 : f32
      %12 = vector.broadcast %cst_10 : f32 to vector<32x128xf32>
      %c0_11 = arith.constant 0 : index
      %c0_12 = arith.constant 0 : index
      %13 = vector.load %arg6[%c0_11, %c0_12] : memref<32x128xf32, #tpu.memory_space<vmem>>, vector<32x128xf32>
      tpu.vector_store %arg6[%c0_11, %c0_12], %12 {strides = array<i32>} : memref<32x128xf32, #tpu.memory_space<vmem>>, vector<32x128xf32>,
    } else {
    }
    %c0 = arith.constant 0 : index
    %c0_1 = arith.constant 0 : index
    %3 = vector.load %arg6[%c0, %c0_1] : memref<32x128xf32, #tpu.memory_space<vmem>>, vector<32x128xf32>
    %c0_2 = arith.constant 0 : index
    %c0_3 = arith.constant 0 : index
    %4 = vector.load %arg3[%c0_2, %c0_3] : memref<32x256xbf16, #tpu.memory_space<vmem>>, vector<32x256xbf16>
    %c0_4 = arith.constant 0 : index
    %c0_5 = arith.constant 0 : index
    %5 = vector.load %arg4[%c0_4, %c0_5] : memref<256x128xbf16, #tpu.memory_space<vmem>>, vector<256x128xbf16>
    %cst = arith.constant dense<0.000000e+00> : vector<32x128xf32>
    %6 = tpu.matmul %4, %5, %cst {dimension_numbers = #tpu.dot_dimension_numbers<[1], [0], [0], [1], [0, 0, 1, 1], [], []>} : vector<32x256xbf16>, vector<256x128xbf16>, vector<32x128xf32> -> vector<32x128xf32>
    %7 = arith.addf %3, %6 : vector<32x128xf32>
    %c0_6 = arith.constant 0 : index
    %c0_7 = arith.constant 0 : index
    %8 = vector.load %arg6[%c0_6, %c0_7] : memref<32x128xf32, #tpu.memory_space<vmem>>, vector<32x128xf32>
    tpu.vector_store %arg6[%c0_6, %c0_7], %7 {strides = array<i32>} : memref<32x128xf32, #tpu.memory_space<vmem>>, vector<32x128xf32>,
    %c0_i32_8 = arith.constant 0 : i32
    %9 = arith.cmpi eq, %arg2, %c0_i32_8 : i32
    %10 = arith.extui %9 : i1 to i32
    %c0_i32_9 = arith.constant 0 : i32
    %11 = arith.cmpi ne, %10, %c0_i32_9 : i32
    scf.if %11 {
      %c0_10 = arith.constant 0 : index
      %c0_11 = arith.constant 0 : index
      %12 = vector.load %arg6[%c0_10, %c0_11] : memref<32x128xf32, #tpu.memory_space<vmem>>, vector<32x128xf32>
      %cst_12 = arith.constant 0.000000e+00 : f32
      %13 = vector.broadcast %cst_12 : f32 to vector<32x128xf32>
      %14 = arith.cmpf oge, %12, %13 : vector<32x128xf32>
      %cst_13 = arith.constant 2.000000e-01 : f32
      %15 = vector.broadcast %cst_13 : f32 to vector<32x128xf32>
      %16 = arith.mulf %15, %12 : vector<32x128xf32>
      %17 = arith.select %14, %12, %16 : vector<32x128xi1>, vector<32x128xf32>
      %c0_14 = arith.constant 0 : index
      %c0_15 = arith.constant 0 : index
      %18 = vector.load %arg5[%c0_14, %c0_15] : memref<32x128xf32, #tpu.memory_space<vmem>>, vector<32x128xf32>
      tpu.vector_store %arg5[%c0_14, %c0_15], %17 {strides = array<i32>} : memref<32x128xf32, #tpu.memory_space<vmem>>, vector<32x128xf32>,
    } else {
    }
    return
  }
  func.func @transform_0(%arg0: i32, %arg1: i32, %arg2: i32) -> (i32, i32) {
    %c0_i32 = arith.constant 0 : i32
    return %arg0, %arg2 : i32, i32
  }
  func.func @transform_1(%arg0: i32, %arg1: i32, %arg2: i32) -> (i32, i32) {
    %c0_i32 = arith.constant 0 : i32
    return %arg2, %arg1 : i32, i32
  }
  func.func @transform_2(%arg0: i32, %arg1: i32, %arg2: i32) -> (i32, i32) {
    %c0_i32 = arith.constant 0 : i32
    return %arg0, %arg1 : i32, i32
  }
}

module attributes {stable_mosaic.version = 11 : i64} {
  func.func @_conv_mm_kernel(%arg0: i32, %arg1: i32, %arg2: i32, %arg3: memref<24x512xbf16, #tpu.memory_space<vmem>>, %arg4: memref<512x128xbf16, #tpu.memory_space<vmem>>, %arg5: memref<24x128xf32, #tpu.memory_space<vmem>>, %arg6: memref<24x128xf32, #tpu.memory_space<vmem>>) attributes {dimension_semantics = [#tpu.dimension_semantics<parallel>, #tpu.dimension_semantics<parallel>, #tpu.dimension_semantics<arbitrary>], iteration_bounds = array<i64: 1, 1, 1>, scalar_prefetch = 0 : i64, scratch_operands = 1 : i64, tpu.core_type = #tpu.core_type<tc>, window_params = [{transform_indices = @transform_0, window_bounds = array<i64: 24, 512>}, {transform_indices = @transform_1, window_bounds = array<i64: 512, 128>}, {transform_indices = @transform_2, window_bounds = array<i64: 24, 128>}]} {
    %c0_i32 = arith.constant 0 : i32
    %0 = arith.cmpi eq, %arg2, %c0_i32 : i32
    %1 = arith.extui %0 : i1 to i32
    %c0_i32_0 = arith.constant 0 : i32
    %2 = arith.cmpi ne, %1, %c0_i32_0 : i32
    scf.if %2 {
      %cst_10 = arith.constant 0.000000e+00 : f32
      %12 = vector.broadcast %cst_10 : f32 to vector<24x128xf32>
      %c0_11 = arith.constant 0 : index
      %c0_12 = arith.constant 0 : index
      %13 = vector.load %arg6[%c0_11, %c0_12] : memref<24x128xf32, #tpu.memory_space<vmem>>, vector<24x128xf32>
      tpu.vector_store %arg6[%c0_11, %c0_12], %12 {strides = array<i32>} : memref<24x128xf32, #tpu.memory_space<vmem>>, vector<24x128xf32>,
    } else {
    }
    %c0 = arith.constant 0 : index
    %c0_1 = arith.constant 0 : index
    %3 = vector.load %arg6[%c0, %c0_1] : memref<24x128xf32, #tpu.memory_space<vmem>>, vector<24x128xf32>
    %c0_2 = arith.constant 0 : index
    %c0_3 = arith.constant 0 : index
    %4 = vector.load %arg3[%c0_2, %c0_3] : memref<24x512xbf16, #tpu.memory_space<vmem>>, vector<24x512xbf16>
    %c0_4 = arith.constant 0 : index
    %c0_5 = arith.constant 0 : index
    %5 = vector.load %arg4[%c0_4, %c0_5] : memref<512x128xbf16, #tpu.memory_space<vmem>>, vector<512x128xbf16>
    %cst = arith.constant dense<0.000000e+00> : vector<24x128xf32>
    %6 = tpu.matmul %4, %5, %cst {dimension_numbers = #tpu.dot_dimension_numbers<[1], [0], [0], [1], [0, 0, 1, 1], [], []>} : vector<24x512xbf16>, vector<512x128xbf16>, vector<24x128xf32> -> vector<24x128xf32>
    %7 = arith.addf %3, %6 : vector<24x128xf32>
    %c0_6 = arith.constant 0 : index
    %c0_7 = arith.constant 0 : index
    %8 = vector.load %arg6[%c0_6, %c0_7] : memref<24x128xf32, #tpu.memory_space<vmem>>, vector<24x128xf32>
    tpu.vector_store %arg6[%c0_6, %c0_7], %7 {strides = array<i32>} : memref<24x128xf32, #tpu.memory_space<vmem>>, vector<24x128xf32>,
    %c0_i32_8 = arith.constant 0 : i32
    %9 = arith.cmpi eq, %arg2, %c0_i32_8 : i32
    %10 = arith.extui %9 : i1 to i32
    %c0_i32_9 = arith.constant 0 : i32
    %11 = arith.cmpi ne, %10, %c0_i32_9 : i32
    scf.if %11 {
      %c0_10 = arith.constant 0 : index
      %c0_11 = arith.constant 0 : index
      %12 = vector.load %arg6[%c0_10, %c0_11] : memref<24x128xf32, #tpu.memory_space<vmem>>, vector<24x128xf32>
      %cst_12 = arith.constant 0.000000e+00 : f32
      %13 = vector.broadcast %cst_12 : f32 to vector<24x128xf32>
      %14 = arith.cmpf oge, %12, %13 : vector<24x128xf32>
      %cst_13 = arith.constant 2.000000e-01 : f32
      %15 = vector.broadcast %cst_13 : f32 to vector<24x128xf32>
      %16 = arith.mulf %15, %12 : vector<24x128xf32>
      %17 = arith.select %14, %12, %16 : vector<24x128xi1>, vector<24x128xf32>
      %c0_14 = arith.constant 0 : index
      %c0_15 = arith.constant 0 : index
      %18 = vector.load %arg5[%c0_14, %c0_15] : memref<24x128xf32, #tpu.memory_space<vmem>>, vector<24x128xf32>
      tpu.vector_store %arg5[%c0_14, %c0_15], %17 {strides = array<i32>} : memref<24x128xf32, #tpu.memory_space<vmem>>, vector<24x128xf32>,
    } else {
    }
    return
  }
  func.func @transform_0(%arg0: i32, %arg1: i32, %arg2: i32) -> (i32, i32) {
    %c0_i32 = arith.constant 0 : i32
    return %arg0, %arg2 : i32, i32
  }
  func.func @transform_1(%arg0: i32, %arg1: i32, %arg2: i32) -> (i32, i32) {
    %c0_i32 = arith.constant 0 : i32
    return %arg2, %arg1 : i32, i32
  }
  func.func @transform_2(%arg0: i32, %arg1: i32, %arg2: i32) -> (i32, i32) {
    %c0_i32 = arith.constant 0 : i32
    return %arg0, %arg1 : i32, i32
  }
}

module attributes {stable_mosaic.version = 11 : i64} {
  func.func @_conv_mm_kernel(%arg0: i32, %arg1: i32, %arg2: i32, %arg3: memref<8x512xbf16, #tpu.memory_space<vmem>>, %arg4: memref<512x128xbf16, #tpu.memory_space<vmem>>, %arg5: memref<8x128xf32, #tpu.memory_space<vmem>>, %arg6: memref<8x128xf32, #tpu.memory_space<vmem>>) attributes {dimension_semantics = [#tpu.dimension_semantics<parallel>, #tpu.dimension_semantics<parallel>, #tpu.dimension_semantics<arbitrary>], iteration_bounds = array<i64: 1, 1, 2>, scalar_prefetch = 0 : i64, scratch_operands = 1 : i64, tpu.core_type = #tpu.core_type<tc>, window_params = [{transform_indices = @transform_0, window_bounds = array<i64: 8, 512>}, {transform_indices = @transform_1, window_bounds = array<i64: 512, 128>}, {transform_indices = @transform_2, window_bounds = array<i64: 8, 128>}]} {
    %c0_i32 = arith.constant 0 : i32
    %0 = arith.cmpi eq, %arg2, %c0_i32 : i32
    %1 = arith.extui %0 : i1 to i32
    %c0_i32_0 = arith.constant 0 : i32
    %2 = arith.cmpi ne, %1, %c0_i32_0 : i32
    scf.if %2 {
      %cst_9 = arith.constant 0.000000e+00 : f32
      %12 = vector.broadcast %cst_9 : f32 to vector<8x128xf32>
      %c0_10 = arith.constant 0 : index
      %c0_11 = arith.constant 0 : index
      %13 = vector.load %arg6[%c0_10, %c0_11] : memref<8x128xf32, #tpu.memory_space<vmem>>, vector<8x128xf32>
      tpu.vector_store %arg6[%c0_10, %c0_11], %12 {strides = array<i32>} : memref<8x128xf32, #tpu.memory_space<vmem>>, vector<8x128xf32>,
    } else {
    }
    %c0 = arith.constant 0 : index
    %c0_1 = arith.constant 0 : index
    %3 = vector.load %arg6[%c0, %c0_1] : memref<8x128xf32, #tpu.memory_space<vmem>>, vector<8x128xf32>
    %c0_2 = arith.constant 0 : index
    %c0_3 = arith.constant 0 : index
    %4 = vector.load %arg3[%c0_2, %c0_3] : memref<8x512xbf16, #tpu.memory_space<vmem>>, vector<8x512xbf16>
    %c0_4 = arith.constant 0 : index
    %c0_5 = arith.constant 0 : index
    %5 = vector.load %arg4[%c0_4, %c0_5] : memref<512x128xbf16, #tpu.memory_space<vmem>>, vector<512x128xbf16>
    %cst = arith.constant dense<0.000000e+00> : vector<8x128xf32>
    %6 = tpu.matmul %4, %5, %cst {dimension_numbers = #tpu.dot_dimension_numbers<[1], [0], [0], [1], [0, 0, 1, 1], [], []>} : vector<8x512xbf16>, vector<512x128xbf16>, vector<8x128xf32> -> vector<8x128xf32>
    %7 = arith.addf %3, %6 : vector<8x128xf32>
    %c0_6 = arith.constant 0 : index
    %c0_7 = arith.constant 0 : index
    %8 = vector.load %arg6[%c0_6, %c0_7] : memref<8x128xf32, #tpu.memory_space<vmem>>, vector<8x128xf32>
    tpu.vector_store %arg6[%c0_6, %c0_7], %7 {strides = array<i32>} : memref<8x128xf32, #tpu.memory_space<vmem>>, vector<8x128xf32>,
    %c1_i32 = arith.constant 1 : i32
    %9 = arith.cmpi eq, %arg2, %c1_i32 : i32
    %10 = arith.extui %9 : i1 to i32
    %c0_i32_8 = arith.constant 0 : i32
    %11 = arith.cmpi ne, %10, %c0_i32_8 : i32
    scf.if %11 {
      %c0_9 = arith.constant 0 : index
      %c0_10 = arith.constant 0 : index
      %12 = vector.load %arg6[%c0_9, %c0_10] : memref<8x128xf32, #tpu.memory_space<vmem>>, vector<8x128xf32>
      %cst_11 = arith.constant 0.000000e+00 : f32
      %13 = vector.broadcast %cst_11 : f32 to vector<8x128xf32>
      %14 = arith.subf %13, %12 : vector<8x128xf32>
      %15 = math.exp %14 : vector<8x128xf32>
      %cst_12 = arith.constant 1.000000e+00 : f32
      %16 = vector.broadcast %cst_12 : f32 to vector<8x128xf32>
      %17 = arith.addf %16, %15 : vector<8x128xf32>
      %cst_13 = arith.constant 1.000000e+00 : f32
      %18 = vector.broadcast %cst_13 : f32 to vector<8x128xf32>
      %19 = arith.divf %18, %17 : vector<8x128xf32>
      %c0_14 = arith.constant 0 : index
      %c0_15 = arith.constant 0 : index
      %20 = vector.load %arg5[%c0_14, %c0_15] : memref<8x128xf32, #tpu.memory_space<vmem>>, vector<8x128xf32>
      tpu.vector_store %arg5[%c0_14, %c0_15], %19 {strides = array<i32>} : memref<8x128xf32, #tpu.memory_space<vmem>>, vector<8x128xf32>,
    } else {
    }
    return
  }
  func.func @transform_0(%arg0: i32, %arg1: i32, %arg2: i32) -> (i32, i32) {
    %c0_i32 = arith.constant 0 : i32
    return %arg0, %arg2 : i32, i32
  }
  func.func @transform_1(%arg0: i32, %arg1: i32, %arg2: i32) -> (i32, i32) {
    %c0_i32 = arith.constant 0 : i32
    return %arg2, %arg1 : i32, i32
  }
  func.func @transform_2(%arg0: i32, %arg1: i32, %arg2: i32) -> (i32, i32) {
    %c0_i32 = arith.constant 0 : i32
    return %arg0, %arg1 : i32, i32
  }
}

</mosaic_0001>

<bundles_post_ra>
// kernel: forward.5
= control target key start
LH: loop header
LB: loop body
LE: loop exit
PB: predicated region body
PF: predicated region fallthrough
CT: control target
= control target key end

     0   :  { %vm400_vm0 = vcmask 523264   ;;  %s1692_s1 = inlined_call_operand.vmem [shape: bf16[64,128], index: 1, kind: input, shape index: {}]   ;;  %s1693_s0 = inlined_call_operand.vmem [shape: bf16[512,64], index: 0, kind: input, shape index: {}]   ;;  %s1694_s2 = inlined_call_operand.vmem [shape: f32[512,128], index: 2, kind: output, shape index: {}]  }
   0x1   :  { %v1332_v0 = vld [vmem:[%s1692_s1 + $0x18] sm:$0xff]  ;;  %v1331_v1 = vld [vmem:[%s1692_s1 + $0x10] sm:$0xff]  ;;  %v1330_v2 = vld [vmem:[%s1692_s1 + $0x8] sm:$0xff] }
   0x2   :  { %501 = vmatpush.bf16.msra.mxu0 %v1332_v0  ;;  %1333 = vmatpush.bf16.msra.mxu1 %v1332_v0  ;;  %v1329_v3 = vld [vmem:[%s1692_s1] sm:$0xff]  ;;  %v1298_v8 = vld [vmem:[%s1693_s0 + $0x8] sm:$0xff]  ;;  %v1299_v12 = vld [vmem:[%s1693_s0 + $0x10] sm:$0xff] }
   0x3   :  { %1334 = vmatpush.bf16.msra.mxu2 %v1332_v0  ;;  %1335 = vmatpush.bf16.msra.mxu3 %v1332_v0  ;;  %v1297_v4 = vld [vmem:[%s1693_s0] sm:$0xff]  ;;  %v1306_v9 = vld [vmem:[%s1693_s0 + $0x48] sm:$0xff]  ;;  %v1307_v13 = vld [vmem:[%s1693_s0 + $0x50] sm:$0xff] }
   0x4   :  { %v1305_v5 = vld [vmem:[%s1693_s0 + $0x40] sm:$0xff]  ;;  %v1314_v10 = vld [vmem:[%s1693_s0 + $0x88] sm:$0xff]  ;;  %v1315_v14 = vld [vmem:[%s1693_s0 + $0x90] sm:$0xff] }
   0x5   :  { %v1313_v6 = vld [vmem:[%s1693_s0 + $0x80] sm:$0xff]  ;;  %v1322_v11 = vld [vmem:[%s1693_s0 + $0xc8] sm:$0xff]  ;;  %v1323_v15 = vld [vmem:[%s1693_s0 + $0xd0] sm:$0xff] }
   0x6   :  { %502 = vmatpush.bf16.msra.mxu0 %v1331_v1  ;;  %1336 = vmatpush.bf16.msra.mxu1 %v1331_v1  ;;  %v1321_v7 = vld [vmem:[%s1693_s0 + $0xc0] sm:$0xff]  ;;  %v1300_v16 = vld [vmem:[%s1693_s0 + $0x18] sm:$0xff]  ;;  %v1302_v24 = vld [vmem:[%s1693_s0 + $0x28] sm:$0xff] }
   0x7   :  { %1337 = vmatpush.bf16.msra.mxu2 %v1331_v1  ;;  %1338 = vmatpush.bf16.msra.mxu3 %v1331_v1  ;;  %v1308_v17 = vld [vmem:[%s1693_s0 + $0x58] sm:$0xff]  ;;  %v1301_v20 = vld [vmem:[%s1693_s0 + $0x20] sm:$0xff]  ;;  %v1310_v25 = vld [vmem:[%s1693_s0 + $0x68] sm:$0xff] }
   0x8   :  { %v1316_v18 = vld [vmem:[%s1693_s0 + $0x98] sm:$0xff]  ;;  %v1309_v21 = vld [vmem:[%s1693_s0 + $0x60] sm:$0xff]  ;;  %v1318_v26 = vld [vmem:[%s1693_s0 + $0xa8] sm:$0xff] }
   0x9   :  { %v1324_v19 = vld [vmem:[%s1693_s0 + $0xd8] sm:$0xff]  ;;  %v1317_v22 = vld [vmem:[%s1693_s0 + $0xa0] sm:$0xff]  ;;  %v1326_v27 = vld [vmem:[%s1693_s0 + $0xe8] sm:$0xff] }
   0xa   :  { %503 = vmatpush.bf16.msra.mxu0 %v1330_v2  ;;  %1339 = vmatpush.bf16.msra.mxu1 %v1330_v2  ;;  %v1325_v23 = vld [vmem:[%s1693_s0 + $0xe0] sm:$0xff]  ;;  %v1303_v28 = vld [vmem:[%s1693_s0 + $0x30] sm:$0xff]  ;;  %v1304_v32 = vld [vmem:[%s1693_s0 + $0x38] sm:$0xff] }
   0xb   :  { %1340 = vmatpush.bf16.msra.mxu2 %v1330_v2  ;;  %1341 = vmatpush.bf16.msra.mxu3 %v1330_v2  ;;  %v1311_v29 = vld [vmem:[%s1693_s0 + $0x70] sm:$0xff]  ;;  %v1312_v33 = vld [vmem:[%s1693_s0 + $0x78] sm:$0xff] }
   0xc   :  { %v1319_v30 = vld [vmem:[%s1693_s0 + $0xb0] sm:$0xff]  ;;  %v1320_v34 = vld [vmem:[%s1693_s0 + $0xb8] sm:$0xff] }
   0xd   :  { %v1327_v31 = vld [vmem:[%s1693_s0 + $0xf0] sm:$0xff]  ;;  %v1328_v35 = vld [vmem:[%s1693_s0 + $0xf8] sm:$0xff] }
   0xe   :  { %504 = vmatpush.bf16.msra.mxu0 %v1329_v3  ;;  %1342 = vmatpush.bf16.msra.mxu1 %v1329_v3 }
   0xf   :  { %1343 = vmatpush.bf16.msra.mxu2 %v1329_v3  ;;  %1344 = vmatpush.bf16.msra.mxu3 %v1329_v3 }
  0x11   :  { %1265 = vmatmul.msk.bf16.vlgmr.msra.gmra.mxu0 %vm400_vm0, %v1297_v4  ;;  %1273 = vmatmul.msk.bf16.vlgmr.msra.gmra.mxu1 %vm400_vm0, %v1305_v5 }
  0x12   :  { %1281 = vmatmul.msk.bf16.vlgmr.msra.gmra.mxu2 %vm400_vm0, %v1313_v6  ;;  %1289 = vmatmul.msk.bf16.vlgmr.msra.gmra.mxu3 %vm400_vm0, %v1321_v7 }
  0x21   :  { %1266 = vmatmul.msk.bf16.gmra.mxu0 %vm400_vm0, %v1298_v8  ;;  %1274 = vmatmul.msk.bf16.gmra.mxu1 %vm400_vm0, %v1306_v9 }
  0x22   :  { %1282 = vmatmul.msk.bf16.gmra.mxu2 %vm400_vm0, %v1314_v10  ;;  %1290 = vmatmul.msk.bf16.gmra.mxu3 %vm400_vm0, %v1322_v11 }
  0x31   :  { %1267 = vmatmul.msk.bf16.gmra.mxu0 %vm400_vm0, %v1299_v12  ;;  %1275 = vmatmul.msk.bf16.gmra.mxu1 %vm400_vm0, %v1307_v13 }
  0x32   :  { %1283 = vmatmul.msk.bf16.gmra.mxu2 %vm400_vm0, %v1315_v14  ;;  %1291 = vmatmul.msk.bf16.gmra.mxu3 %vm400_vm0, %v1323_v15 }
  0x41   :  { %1268 = vmatmul.msk.bf16.gmra.mxu0 %vm400_vm0, %v1300_v16  ;;  %1276 = vmatmul.msk.bf16.gmra.mxu1 %vm400_vm0, %v1308_v17 }
  0x42   :  { %1284 = vmatmul.msk.bf16.gmra.mxu2 %vm400_vm0, %v1316_v18  ;;  %1292 = vmatmul.msk.bf16.gmra.mxu3 %vm400_vm0, %v1324_v19 }
  0x51   :  { %1269 = vmatmul.msk.bf16.gmra.mxu0 %vm400_vm0, %v1301_v20  ;;  %1277 = vmatmul.msk.bf16.gmra.mxu1 %vm400_vm0, %v1309_v21 }
  0x52   :  { %1285 = vmatmul.msk.bf16.gmra.mxu2 %vm400_vm0, %v1317_v22  ;;  %1293 = vmatmul.msk.bf16.gmra.mxu3 %vm400_vm0, %v1325_v23 }
  0x61   :  { %1270 = vmatmul.msk.bf16.gmra.mxu0 %vm400_vm0, %v1302_v24  ;;  %1278 = vmatmul.msk.bf16.gmra.mxu1 %vm400_vm0, %v1310_v25 }
  0x62   :  { %1286 = vmatmul.msk.bf16.gmra.mxu2 %vm400_vm0, %v1318_v26  ;;  %1294 = vmatmul.msk.bf16.gmra.mxu3 %vm400_vm0, %v1326_v27 }
  0x71   :  { %1271 = vmatmul.msk.bf16.gmra.mxu0 %vm400_vm0, %v1303_v28  ;;  %1279 = vmatmul.msk.bf16.gmra.mxu1 %vm400_vm0, %v1311_v29 }
  0x72   :  { %1287 = vmatmul.msk.bf16.gmra.mxu2 %vm400_vm0, %v1319_v30  ;;  %1295 = vmatmul.msk.bf16.gmra.mxu3 %vm400_vm0, %v1327_v31 }
  0x81   :  { %1272 = vmatmul.msk.bf16.gmra.mxu0 %vm400_vm0, %v1304_v32  ;;  %1280 = vmatmul.msk.bf16.gmra.mxu1 %vm400_vm0, %v1312_v33 }
  0x82   :  { %1288 = vmatmul.msk.bf16.gmra.mxu2 %vm400_vm0, %v1320_v34  ;;  %1296 = vmatmul.msk.bf16.gmra.mxu3 %vm400_vm0, %v1328_v35 }
  0x8e   :  { %v506_v36 = vpop.f32.mrf.mxu0  ;;  %v546_v37 = vpop.f32.mrf.mxu1 }
  0x8f   :  { %vm861_vm1 = vcmp.ge.f32.partialorder %v506_v36, 0.0  ;;  %v925_v38 = vmul.f32 0.2, %v506_v36  ;;  %vm877_vm2 = vcmp.ge.f32.partialorder %v546_v37, 0.0  ;;  %v941_v39 = vmul.f32 0.2, %v546_v37 }
  0x91   :  { %v989_v40 = vsel %vm861_vm1, %v506_v36, %v925_v38  ;;  %v1005_v41 = vsel %vm877_vm2, %v546_v37, %v941_v39 }
  0x92   :  { %1053 = vst [vmem:[%s1694_s2] sm:$0xff] %v989_v40 }
  0x93   :  { %1069 = vst [vmem:[%s1694_s2 + $0x80] sm:$0xff] %v1005_v41 }
  0x95   :  { %v586_v42 = vpop.f32.mrf.mxu2  ;;  %v626_v43 = vpop.f32.mrf.mxu3 }
  0x96   :  { %vm893_vm3 = vcmp.ge.f32.partialorder %v586_v42, 0.0  ;;  %v957_v44 = vmul.f32 0.2, %v586_v42  ;;  %vm909_vm4 = vcmp.ge.f32.partialorder %v626_v43, 0.0  ;;  %v973_v45 = vmul.f32 0.2, %v626_v43  ;;  %v508_v46 = vpop.f32.mrf.mxu0  ;;  %v548_v47 = vpop.f32.mrf.mxu1 }
  0x97   :  { %vm862_vm5 = vcmp.ge.f32.partialorder %v508_v46, 0.0  ;;  %v926_v48 = vmul.f32 0.2, %v508_v46  ;;  %vm878_vm6 = vcmp.ge.f32.partialorder %v548_v47, 0.0  ;;  %v942_v49 = vmul.f32 0.2, %v548_v47 }
  0x98   :  { %v1021_v50 = vsel %vm893_vm3, %v586_v42, %v957_v44  ;;  %v1037_v51 = vsel %vm909_vm4, %v626_v43, %v973_v45 }
  0x99   :  { %1085 = vst [vmem:[%s1694_s2 + $0x100] sm:$0xff] %v1021_v50  ;;  %v990_v52 = vsel %vm862_vm5, %v508_v46, %v926_v48  ;;  %v1006_v53 = vsel %vm878_vm6, %v548_v47, %v942_v49 }
  0x9a   :  { %1101 = vst [vmem:[%s1694_s2 + $0x180] sm:$0xff] %v1037_v51 }
  0x9b   :  { %1054 = vst [vmem:[%s1694_s2 + $0x8] sm:$0xff] %v990_v52 }
  0x9c   :  { %1070 = vst [vmem:[%s1694_s2 + $0x88] sm:$0xff] %v1006_v53 }
  0x9d   :  { %v588_v54 = vpop.f32.mrf.mxu2  ;;  %v628_v55 = vpop.f32.mrf.mxu3 }
  0x9e   :  { %vm894_vm7 = vcmp.ge.f32.partialorder %v588_v54, 0.0  ;;  %v958_v56 = vmul.f32 0.2, %v588_v54  ;;  %vm910_vm8 = vcmp.ge.f32.partialorder %v628_v55, 0.0  ;;  %v974_v57 = vmul.f32 0.2, %v628_v55  ;;  %v511_v58 = vpop.f32.mrf.mxu0  ;;  %v551_v59 = vpop.f32.mrf.mxu1 }
  0x9f   :  { %vm863_vm9 = vcmp.ge.f32.partialorder %v511_v58, 0.0  ;;  %v927_v60 = vmul.f32 0.2, %v511_v58  ;;  %vm879_vm10 = vcmp.ge.f32.partialorder %v551_v59, 0.0  ;;  %v943_v61 = vmul.f32 0.2, %v551_v59 }
  0xa0   :  { %v1022_v62 = vsel %vm894_vm7, %v588_v54, %v958_v56  ;;  %v1038_v63 = vsel %vm910_vm8, %v628_v55, %v974_v57 }
  0xa1   :  { %1086 = vst [vmem:[%s1694_s2 + $0x108] sm:$0xff] %v1022_v62  ;;  %v991_v0 = vsel %vm863_vm9, %v511_v58, %v927_v60  ;;  %v1007_v1 = vsel %vm879_vm10, %v551_v59, %v943_v61 }
  0xa2   :  { %1102 = vst [vmem:[%s1694_s2 + $0x188] sm:$0xff] %v1038_v63 }
  0xa3   :  { %1055 = vst [vmem:[%s1694_s2 + $0x10] sm:$0xff] %v991_v0 }
  0xa4   :  { %1071 = vst [vmem:[%s1694_s2 + $0x90] sm:$0xff] %v1007_v1 }
  0xa5   :  { %v591_v2 = vpop.f32.mrf.mxu2  ;;  %v631_v3 = vpop.f32.mrf.mxu3 }
  0xa6   :  { %vm895_vm11 = vcmp.ge.f32.partialorder %v591_v2, 0.0  ;;  %v959_v4 = vmul.f32 0.2, %v591_v2  ;;  %vm911_vm12 = vcmp.ge.f32.partialorder %v631_v3, 0.0  ;;  %v975_v5 = vmul.f32 0.2, %v631_v3  ;;  %v513_v6 = vpop.f32.mrf.mxu0  ;;  %v553_v7 = vpop.f32.mrf.mxu1 }
  0xa7   :  { %vm864_vm13 = vcmp.ge.f32.partialorder %v513_v6, 0.0  ;;  %v928_v8 = vmul.f32 0.2, %v513_v6  ;;  %vm880_vm14 = vcmp.ge.f32.partialorder %v553_v7, 0.0  ;;  %v944_v9 = vmul.f32 0.2, %v553_v7 }
  0xa8   :  { %v1023_v10 = vsel %vm895_vm11, %v591_v2, %v959_v4  ;;  %v1039_v11 = vsel %vm911_vm12, %v631_v3, %v975_v5 }
  0xa9   :  { %1087 = vst [vmem:[%s1694_s2 + $0x110] sm:$0xff] %v1023_v10  ;;  %v992_v12 = vsel %vm864_vm13, %v513_v6, %v928_v8  ;;  %v1008_v13 = vsel %vm880_vm14, %v553_v7, %v944_v9 }
  0xaa   :  { %1103 = vst [vmem:[%s1694_s2 + $0x190] sm:$0xff] %v1039_v11 }
  0xab   :  { %1056 = vst [vmem:[%s1694_s2 + $0x18] sm:$0xff] %v992_v12 }
  0xac   :  { %1072 = vst [vmem:[%s1694_s2 + $0x98] sm:$0xff] %v1008_v13 }
  0xad   :  { %v593_v14 = vpop.f32.mrf.mxu2  ;;  %v633_v15 = vpop.f32.mrf.mxu3 }
  0xae   :  { %vm896_vm15 = vcmp.ge.f32.partialorder %v593_v14, 0.0  ;;  %v960_v16 = vmul.f32 0.2, %v593_v14  ;;  %vm912_vm0 = vcmp.ge.f32.partialorder %v633_v15, 0.0  ;;  %v976_v17 = vmul.f32 0.2, %v633_v15  ;;  %v516_v18 = vpop.f32.mrf.mxu0  ;;  %v556_v19 = vpop.f32.mrf.mxu1 }
  0xaf   :  { %vm865_vm1 = vcmp.ge.f32.partialorder %v516_v18, 0.0  ;;  %v929_v20 = vmul.f32 0.2, %v516_v18  ;;  %vm881_vm2 = vcmp.ge.f32.partialorder %v556_v19, 0.0  ;;  %v945_v21 = vmul.f32 0.2, %v556_v19 }
  0xb0   :  { %v1024_v22 = vsel %vm896_vm15, %v593_v14, %v960_v16  ;;  %v1040_v23 = vsel %vm912_vm0, %v633_v15, %v976_v17 }
  0xb1   :  { %1088 = vst [vmem:[%s1694_s2 + $0x118] sm:$0xff] %v1024_v22  ;;  %v993_v24 = vsel %vm865_vm1, %v516_v18, %v929_v20  ;;  %v1009_v25 = vsel %vm881_vm2, %v556_v19, %v945_v21 }
  0xb2   :  { %1104 = vst [vmem:[%s1694_s2 + $0x198] sm:$0xff] %v1040_v23 }
  0xb3   :  { %1057 = vst [vmem:[%s1694_s2 + $0x20] sm:$0xff] %v993_v24 }
  0xb4   :  { %1073 = vst [vmem:[%s1694_s2 + $0xa0] sm:$0xff] %v1009_v25 }
  0xb5   :  { %v596_v26 = vpop.f32.mrf.mxu2  ;;  %v636_v27 = vpop.f32.mrf.mxu3 }
  0xb6   :  { %vm897_vm3 = vcmp.ge.f32.partialorder %v596_v26, 0.0  ;;  %v961_v28 = vmul.f32 0.2, %v596_v26  ;;  %vm913_vm4 = vcmp.ge.f32.partialorder %v636_v27, 0.0  ;;  %v977_v29 = vmul.f32 0.2, %v636_v27  ;;  %v518_v30 = vpop.f32.mrf.mxu0  ;;  %v558_v31 = vpop.f32.mrf.mxu1 }
  0xb7   :  { %vm866_vm5 = vcmp.ge.f32.partialorder %v518_v30, 0.0  ;;  %v930_v32 = vmul.f32 0.2, %v518_v30  ;;  %vm882_vm6 = vcmp.ge.f32.partialorder %v558_v31, 0.0  ;;  %v946_v33 = vmul.f32 0.2, %v558_v31 }
  0xb8   :  { %v1025_v34 = vsel %vm897_vm3, %v596_v26, %v961_v28  ;;  %v1041_v35 = vsel %vm913_vm4, %v636_v27, %v977_v29 }
  0xb9   :  { %1089 = vst [vmem:[%s1694_s2 + $0x120] sm:$0xff] %v1025_v34  ;;  %v994_v36 = vsel %vm866_vm5, %v518_v30, %v930_v32  ;;  %v1010_v37 = vsel %vm882_vm6, %v558_v31, %v946_v33 }
  0xba   :  { %1105 = vst [vmem:[%s1694_s2 + $0x1a0] sm:$0xff] %v1041_v35 }
  0xbb   :  { %1058 = vst [vmem:[%s1694_s2 + $0x28] sm:$0xff] %v994_v36 }
  0xbc   :  { %1074 = vst [vmem:[%s1694_s2 + $0xa8] sm:$0xff] %v1010_v37 }
  0xbd   :  { %v598_v38 = vpop.f32.mrf.mxu2  ;;  %v638_v39 = vpop.f32.mrf.mxu3 }
  0xbe   :  { %vm898_vm7 = vcmp.ge.f32.partialorder %v598_v38, 0.0  ;;  %v962_v40 = vmul.f32 0.2, %v598_v38  ;;  %vm914_vm8 = vcmp.ge.f32.partialorder %v638_v39, 0.0  ;;  %v978_v41 = vmul.f32 0.2, %v638_v39  ;;  %v521_v42 = vpop.f32.mrf.mxu0  ;;  %v561_v43 = vpop.f32.mrf.mxu1 }
  0xbf   :  { %vm867_vm9 = vcmp.ge.f32.partialorder %v521_v42, 0.0  ;;  %v931_v44 = vmul.f32 0.2, %v521_v42  ;;  %vm883_vm10 = vcmp.ge.f32.partialorder %v561_v43, 0.0  ;;  %v947_v45 = vmul.f32 0.2, %v561_v43 }
  0xc0   :  { %v1026_v46 = vsel %vm898_vm7, %v598_v38, %v962_v40  ;;  %v1042_v47 = vsel %vm914_vm8, %v638_v39, %v978_v41 }
  0xc1   :  { %1090 = vst [vmem:[%s1694_s2 + $0x128] sm:$0xff] %v1026_v46  ;;  %v995_v48 = vsel %vm867_vm9, %v521_v42, %v931_v44  ;;  %v1011_v49 = vsel %vm883_vm10, %v561_v43, %v947_v45 }
  0xc2   :  { %1106 = vst [vmem:[%s1694_s2 + $0x1a8] sm:$0xff] %v1042_v47 }
  0xc3   :  { %1059 = vst [vmem:[%s1694_s2 + $0x30] sm:$0xff] %v995_v48 }
  0xc4   :  { %1075 = vst [vmem:[%s1694_s2 + $0xb0] sm:$0xff] %v1011_v49 }
  0xc5   :  { %v601_v50 = vpop.f32.mrf.mxu2  ;;  %v641_v51 = vpop.f32.mrf.mxu3 }
  0xc6   :  { %vm899_vm11 = vcmp.ge.f32.partialorder %v601_v50, 0.0  ;;  %v963_v52 = vmul.f32 0.2, %v601_v50  ;;  %vm915_vm12 = vcmp.ge.f32.partialorder %v641_v51, 0.0  ;;  %v979_v53 = vmul.f32 0.2, %v641_v51  ;;  %v523_v54 = vpop.f32.mrf.mxu0  ;;  %v563_v55 = vpop.f32.mrf.mxu1 }
  0xc7   :  { %vm868_vm13 = vcmp.ge.f32.partialorder %v523_v54, 0.0  ;;  %v932_v56 = vmul.f32 0.2, %v523_v54  ;;  %vm884_vm14 = vcmp.ge.f32.partialorder %v563_v55, 0.0  ;;  %v948_v57 = vmul.f32 0.2, %v563_v55 }
  0xc8   :  { %v1027_v58 = vsel %vm899_vm11, %v601_v50, %v963_v52  ;;  %v1043_v59 = vsel %vm915_vm12, %v641_v51, %v979_v53 }
  0xc9   :  { %1091 = vst [vmem:[%s1694_s2 + $0x130] sm:$0xff] %v1027_v58  ;;  %v996_v60 = vsel %vm868_vm13, %v523_v54, %v932_v56  ;;  %v1012_v61 = vsel %vm884_vm14, %v563_v55, %v948_v57 }
  0xca   :  { %1107 = vst [vmem:[%s1694_s2 + $0x1b0] sm:$0xff] %v1043_v59 }
  0xcb   :  { %1060 = vst [vmem:[%s1694_s2 + $0x38] sm:$0xff] %v996_v60 }
  0xcc   :  { %1076 = vst [vmem:[%s1694_s2 + $0xb8] sm:$0xff] %v1012_v61 }
  0xcd   :  { %v603_v62 = vpop.f32.mrf.mxu2  ;;  %v643_v63 = vpop.f32.mrf.mxu3 }
  0xce   :  { %vm900_vm15 = vcmp.ge.f32.partialorder %v603_v62, 0.0  ;;  %v964_v0 = vmul.f32 0.2, %v603_v62  ;;  %vm916_vm0 = vcmp.ge.f32.partialorder %v643_v63, 0.0  ;;  %v980_v1 = vmul.f32 0.2, %v643_v63  ;;  %v526_v2 = vpop.f32.mrf.mxu0  ;;  %v566_v3 = vpop.f32.mrf.mxu1 }
  0xcf   :  { %vm869_vm1 = vcmp.ge.f32.partialorder %v526_v2, 0.0  ;;  %v933_v4 = vmul.f32 0.2, %v526_v2  ;;  %vm885_vm2 = vcmp.ge.f32.partialorder %v566_v3, 0.0  ;;  %v949_v5 = vmul.f32 0.2, %v566_v3 }
  0xd0   :  { %v1028_v6 = vsel %vm900_vm15, %v603_v62, %v964_v0  ;;  %v1044_v7 = vsel %vm916_vm0, %v643_v63, %v980_v1 }
  0xd1   :  { %1092 = vst [vmem:[%s1694_s2 + $0x138] sm:$0xff] %v1028_v6  ;;  %v997_v8 = vsel %vm869_vm1, %v526_v2, %v933_v4  ;;  %v1013_v9 = vsel %vm885_vm2, %v566_v3, %v949_v5 }
  0xd2   :  { %1108 = vst [vmem:[%s1694_s2 + $0x1b8] sm:$0xff] %v1044_v7 }
  0xd3   :  { %1061 = vst [vmem:[%s1694_s2 + $0x40] sm:$0xff] %v997_v8 }
  0xd4   :  { %1077 = vst [vmem:[%s1694_s2 + $0xc0] sm:$0xff] %v1013_v9 }
  0xd5   :  { %v606_v10 = vpop.f32.mrf.mxu2  ;;  %v646_v11 = vpop.f32.mrf.mxu3 }
  0xd6   :  { %vm901_vm3 = vcmp.ge.f32.partialorder %v606_v10, 0.0  ;;  %v965_v12 = vmul.f32 0.2, %v606_v10  ;;  %vm917_vm4 = vcmp.ge.f32.partialorder %v646_v11, 0.0  ;;  %v981_v13 = vmul.f32 0.2, %v646_v11  ;;  %v528_v14 = vpop.f32.mrf.mxu0  ;;  %v568_v15 = vpop.f32.mrf.mxu1 }
  0xd7   :  { %vm870_vm5 = vcmp.ge.f32.partialorder %v528_v14, 0.0  ;;  %v934_v16 = vmul.f32 0.2, %v528_v14  ;;  %vm886_vm6 = vcmp.ge.f32.partialorder %v568_v15, 0.0  ;;  %v950_v17 = vmul.f32 0.2, %v568_v15 }
  0xd8   :  { %v1029_v18 = vsel %vm901_vm3, %v606_v10, %v965_v12  ;;  %v1045_v19 = vsel %vm917_vm4, %v646_v11, %v981_v13 }
  0xd9   :  { %1093 = vst [vmem:[%s1694_s2 + $0x140] sm:$0xff] %v1029_v18  ;;  %v998_v20 = vsel %vm870_vm5, %v528_v14, %v934_v16  ;;  %v1014_v21 = vsel %vm886_vm6, %v568_v15, %v950_v17 }
  0xda   :  { %1109 = vst [vmem:[%s1694_s2 + $0x1c0] sm:$0xff] %v1045_v19 }
  0xdb   :  { %1062 = vst [vmem:[%s1694_s2 + $0x48] sm:$0xff] %v998_v20 }
  0xdc   :  { %1078 = vst [vmem:[%s1694_s2 + $0xc8] sm:$0xff] %v1014_v21 }
  0xdd   :  { %v608_v22 = vpop.f32.mrf.mxu2  ;;  %v648_v23 = vpop.f32.mrf.mxu3 }
  0xde   :  { %vm902_vm7 = vcmp.ge.f32.partialorder %v608_v22, 0.0  ;;  %v966_v24 = vmul.f32 0.2, %v608_v22  ;;  %vm918_vm8 = vcmp.ge.f32.partialorder %v648_v23, 0.0  ;;  %v982_v25 = vmul.f32 0.2, %v648_v23  ;;  %v531_v26 = vpop.f32.mrf.mxu0  ;;  %v571_v27 = vpop.f32.mrf.mxu1 }
  0xdf   :  { %vm871_vm9 = vcmp.ge.f32.partialorder %v531_v26, 0.0  ;;  %v935_v28 = vmul.f32 0.2, %v531_v26  ;;  %vm887_vm10 = vcmp.ge.f32.partialorder %v571_v27, 0.0  ;;  %v951_v29 = vmul.f32 0.2, %v571_v27 }
  0xe0   :  { %v1030_v30 = vsel %vm902_vm7, %v608_v22, %v966_v24  ;;  %v1046_v31 = vsel %vm918_vm8, %v648_v23, %v982_v25 }
  0xe1   :  { %1094 = vst [vmem:[%s1694_s2 + $0x148] sm:$0xff] %v1030_v30  ;;  %v999_v32 = vsel %vm871_vm9, %v531_v26, %v935_v28  ;;  %v1015_v33 = vsel %vm887_vm10, %v571_v27, %v951_v29 }
  0xe2   :  { %1110 = vst [vmem:[%s1694_s2 + $0x1c8] sm:$0xff] %v1046_v31 }
  0xe3   :  { %1063 = vst [vmem:[%s1694_s2 + $0x50] sm:$0xff] %v999_v32 }
  0xe4   :  { %1079 = vst [vmem:[%s1694_s2 + $0xd0] sm:$0xff] %v1015_v33 }
  0xe5   :  { %v611_v34 = vpop.f32.mrf.mxu2  ;;  %v651_v35 = vpop.f32.mrf.mxu3 }
  0xe6   :  { %vm903_vm11 = vcmp.ge.f32.partialorder %v611_v34, 0.0  ;;  %v967_v36 = vmul.f32 0.2, %v611_v34  ;;  %vm919_vm12 = vcmp.ge.f32.partialorder %v651_v35, 0.0  ;;  %v983_v37 = vmul.f32 0.2, %v651_v35  ;;  %v533_v38 = vpop.f32.mrf.mxu0  ;;  %v573_v39 = vpop.f32.mrf.mxu1 }
  0xe7   :  { %vm872_vm13 = vcmp.ge.f32.partialorder %v533_v38, 0.0  ;;  %v936_v40 = vmul.f32 0.2, %v533_v38  ;;  %vm888_vm14 = vcmp.ge.f32.partialorder %v573_v39, 0.0  ;;  %v952_v41 = vmul.f32 0.2, %v573_v39 }
  0xe8   :  { %v1031_v42 = vsel %vm903_vm11, %v611_v34, %v967_v36  ;;  %v1047_v43 = vsel %vm919_vm12, %v651_v35, %v983_v37 }
  0xe9   :  { %1095 = vst [vmem:[%s1694_s2 + $0x150] sm:$0xff] %v1031_v42  ;;  %v1000_v44 = vsel %vm872_vm13, %v533_v38, %v936_v40  ;;  %v1016_v45 = vsel %vm888_vm14, %v573_v39, %v952_v41 }
  0xea   :  { %1111 = vst [vmem:[%s1694_s2 + $0x1d0] sm:$0xff] %v1047_v43 }
  0xeb   :  { %1064 = vst [vmem:[%s1694_s2 + $0x58] sm:$0xff] %v1000_v44 }
  0xec   :  { %1080 = vst [vmem:[%s1694_s2 + $0xd8] sm:$0xff] %v1016_v45 }
  0xed   :  { %v613_v46 = vpop.f32.mrf.mxu2  ;;  %v653_v47 = vpop.f32.mrf.mxu3 }
  0xee   :  { %vm904_vm15 = vcmp.ge.f32.partialorder %v613_v46, 0.0  ;;  %v968_v48 = vmul.f32 0.2, %v613_v46  ;;  %vm920_vm0 = vcmp.ge.f32.partialorder %v653_v47, 0.0  ;;  %v984_v49 = vmul.f32 0.2, %v653_v47  ;;  %v536_v50 = vpop.f32.mrf.mxu0  ;;  %v576_v51 = vpop.f32.mrf.mxu1 }
  0xef   :  { %vm873_vm1 = vcmp.ge.f32.partialorder %v536_v50, 0.0  ;;  %v937_v52 = vmul.f32 0.2, %v536_v50  ;;  %vm889_vm2 = vcmp.ge.f32.partialorder %v576_v51, 0.0  ;;  %v953_v53 = vmul.f32 0.2, %v576_v51 }
  0xf0   :  { %v1032_v54 = vsel %vm904_vm15, %v613_v46, %v968_v48  ;;  %v1048_v55 = vsel %vm920_vm0, %v653_v47, %v984_v49 }
  0xf1   :  { %1096 = vst [vmem:[%s1694_s2 + $0x158] sm:$0xff] %v1032_v54  ;;  %v1001_v56 = vsel %vm873_vm1, %v536_v50, %v937_v52  ;;  %v1017_v57 = vsel %vm889_vm2, %v576_v51, %v953_v53 }
  0xf2   :  { %1112 = vst [vmem:[%s1694_s2 + $0x1d8] sm:$0xff] %v1048_v55 }
  0xf3   :  { %1065 = vst [vmem:[%s1694_s2 + $0x60] sm:$0xff] %v1001_v56 }
  0xf4   :  { %1081 = vst [vmem:[%s1694_s2 + $0xe0] sm:$0xff] %v1017_v57 }
  0xf5   :  { %v616_v58 = vpop.f32.mrf.mxu2  ;;  %v656_v59 = vpop.f32.mrf.mxu3 }
  0xf6   :  { %vm905_vm3 = vcmp.ge.f32.partialorder %v616_v58, 0.0  ;;  %v969_v60 = vmul.f32 0.2, %v616_v58  ;;  %vm921_vm4 = vcmp.ge.f32.partialorder %v656_v59, 0.0  ;;  %v985_v61 = vmul.f32 0.2, %v656_v59  ;;  %v538_v62 = vpop.f32.mrf.mxu0  ;;  %v578_v63 = vpop.f32.mrf.mxu1 }
  0xf7   :  { %vm874_vm5 = vcmp.ge.f32.partialorder %v538_v62, 0.0  ;;  %v938_v0 = vmul.f32 0.2, %v538_v62  ;;  %vm890_vm6 = vcmp.ge.f32.partialorder %v578_v63, 0.0  ;;  %v954_v1 = vmul.f32 0.2, %v578_v63 }
  0xf8   :  { %v1033_v2 = vsel %vm905_vm3, %v616_v58, %v969_v60  ;;  %v1049_v3 = vsel %vm921_vm4, %v656_v59, %v985_v61 }
  0xf9   :  { %1097 = vst [vmem:[%s1694_s2 + $0x160] sm:$0xff] %v1033_v2  ;;  %v1002_v4 = vsel %vm874_vm5, %v538_v62, %v938_v0  ;;  %v1018_v5 = vsel %vm890_vm6, %v578_v63, %v954_v1 }
  0xfa   :  { %1113 = vst [vmem:[%s1694_s2 + $0x1e0] sm:$0xff] %v1049_v3 }
  0xfb   :  { %1066 = vst [vmem:[%s1694_s2 + $0x68] sm:$0xff] %v1002_v4 }
  0xfc   :  { %1082 = vst [vmem:[%s1694_s2 + $0xe8] sm:$0xff] %v1018_v5 }
  0xfd   :  { %v618_v6 = vpop.f32.mrf.mxu2  ;;  %v658_v7 = vpop.f32.mrf.mxu3 }
  0xfe   :  { %vm906_vm7 = vcmp.ge.f32.partialorder %v618_v6, 0.0  ;;  %v970_v8 = vmul.f32 0.2, %v618_v6  ;;  %vm922_vm8 = vcmp.ge.f32.partialorder %v658_v7, 0.0  ;;  %v986_v9 = vmul.f32 0.2, %v658_v7  ;;  %v541_v10 = vpop.f32.mrf.mxu0  ;;  %v581_v11 = vpop.f32.mrf.mxu1 }
  0xff   :  { %vm875_vm9 = vcmp.ge.f32.partialorder %v541_v10, 0.0  ;;  %v939_v12 = vmul.f32 0.2, %v541_v10  ;;  %vm891_vm10 = vcmp.ge.f32.partialorder %v581_v11, 0.0  ;;  %v955_v13 = vmul.f32 0.2, %v581_v11 }
 0x100   :  { %v1034_v14 = vsel %vm906_vm7, %v618_v6, %v970_v8  ;;  %v1050_v15 = vsel %vm922_vm8, %v658_v7, %v986_v9 }
 0x101   :  { %1098 = vst [vmem:[%s1694_s2 + $0x168] sm:$0xff] %v1034_v14  ;;  %v1003_v16 = vsel %vm875_vm9, %v541_v10, %v939_v12  ;;  %v1019_v17 = vsel %vm891_vm10, %v581_v11, %v955_v13 }
 0x102   :  { %1114 = vst [vmem:[%s1694_s2 + $0x1e8] sm:$0xff] %v1050_v15 }
 0x103   :  { %1067 = vst [vmem:[%s1694_s2 + $0x70] sm:$0xff] %v1003_v16 }
 0x104   :  { %1083 = vst [vmem:[%s1694_s2 + $0xf0] sm:$0xff] %v1019_v17 }
 0x105   :  { %v621_v18 = vpop.f32.mrf.mxu2  ;;  %v661_v19 = vpop.f32.mrf.mxu3 }
 0x106   :  { %vm907_vm11 = vcmp.ge.f32.partialorder %v621_v18, 0.0  ;;  %v971_v20 = vmul.f32 0.2, %v621_v18  ;;  %vm923_vm12 = vcmp.ge.f32.partialorder %v661_v19, 0.0  ;;  %v987_v21 = vmul.f32 0.2, %v661_v19  ;;  %v543_v22 = vpop.f32.mrf.mxu0  ;;  %v583_v23 = vpop.f32.mrf.mxu1 }
 0x107   :  { %vm876_vm13 = vcmp.ge.f32.partialorder %v543_v22, 0.0  ;;  %v940_v24 = vmul.f32 0.2, %v543_v22  ;;  %vm892_vm14 = vcmp.ge.f32.partialorder %v583_v23, 0.0  ;;  %v956_v25 = vmul.f32 0.2, %v583_v23 }
 0x108   :  { %v1035_v26 = vsel %vm907_vm11, %v621_v18, %v971_v20  ;;  %v1051_v27 = vsel %vm923_vm12, %v661_v19, %v987_v21 }
 0x109   :  { %1099 = vst [vmem:[%s1694_s2 + $0x170] sm:$0xff] %v1035_v26  ;;  %v1004_v28 = vsel %vm876_vm13, %v543_v22, %v940_v24  ;;  %v1020_v29 = vsel %vm892_vm14, %v583_v23, %v956_v25 }
 0x10a   :  { %1115 = vst [vmem:[%s1694_s2 + $0x1f0] sm:$0xff] %v1051_v27 }
 0x10b   :  { %1068 = vst [vmem:[%s1694_s2 + $0x78] sm:$0xff] %v1004_v28 }
 0x10c   :  { %1084 = vst [vmem:[%s1694_s2 + $0xf8] sm:$0xff] %v1020_v29 }
 0x10d   :  { %v623_v30 = vpop.f32.mrf.mxu2  ;;  %v663_v31 = vpop.f32.mrf.mxu3 }
 0x10e   :  { %vm908_vm15 = vcmp.ge.f32.partialorder %v623_v30, 0.0  ;;  %v972_v32 = vmul.f32 0.2, %v623_v30  ;;  %vm924_vm0 = vcmp.ge.f32.partialorder %v663_v31, 0.0  ;;  %v988_v33 = vmul.f32 0.2, %v663_v31 }
 0x110   :  { %v1036_v34 = vsel %vm908_vm15, %v623_v30, %v972_v32  ;;  %v1052_v35 = vsel %vm924_vm0, %v663_v31, %v988_v33 }
 0x111   :  { %1100 = vst [vmem:[%s1694_s2 + $0x178] sm:$0xff] %v1036_v34 }
 0x112   :  { %1116 = vst [vmem:[%s1694_s2 + $0x1f8] sm:$0xff] %v1052_v35 }

// kernel: forward.6
= control target key start
LH: loop header
LB: loop body
LE: loop exit
PB: predicated region body
PF: predicated region fallthrough
CT: control target
= control target key end

     0   :  { %s558_s1 = inlined_call_operand.vmem [shape: bf16[128,128], index: 1, kind: input, shape index: {}]   ;;  %s559_s0 = inlined_call_operand.vmem [shape: bf16[128,128], index: 0, kind: input, shape index: {}]   ;;  %s560_s2 = inlined_call_operand.vmem [shape: f32[128,128], index: 2, kind: output, shape index: {}]  }
   0x1   :  { %v422_v0 = vld [vmem:[%s558_s1 + $0x38] sm:$0xff]  ;;  %v421_v1 = vld [vmem:[%s558_s1 + $0x30] sm:$0xff]  ;;  %v420_v2 = vld [vmem:[%s558_s1 + $0x28] sm:$0xff] }
   0x2   :  { %175 = vmatpush.bf16.msra.mxu0 %v422_v0  ;;  %423 = vmatpush.bf16.msra.mxu1 %v422_v0  ;;  %v419_v3 = vld [vmem:[%s558_s1 + $0x20] sm:$0xff]  ;;  %v418_v4 = vld [vmem:[%s558_s1 + $0x18] sm:$0xff]  ;;  %v417_v5 = vld [vmem:[%s558_s1 + $0x10] sm:$0xff] }
   0x3   :  { %424 = vmatpush.bf16.msra.mxu2 %v422_v0  ;;  %425 = vmatpush.bf16.msra.mxu3 %v422_v0  ;;  %v416_v6 = vld [vmem:[%s558_s1 + $0x8] sm:$0xff]  ;;  %v415_v7 = vld [vmem:[%s558_s1] sm:$0xff]  ;;  %v409_v9 = vld [vmem:[%s559_s0 + $0x10] sm:$0xff] }
   0x4   :  { %v407_v8 = vld [vmem:[%s559_s0] sm:$0xff]  ;;  %v413_v11 = vld [vmem:[%s559_s0 + $0x30] sm:$0xff]  ;;  %v408_v12 = vld [vmem:[%s559_s0 + $0x8] sm:$0xff] }
   0x5   :  { %v411_v10 = vld [vmem:[%s559_s0 + $0x20] sm:$0xff]  ;;  %v410_v13 = vld [vmem:[%s559_s0 + $0x18] sm:$0xff]  ;;  %v412_v14 = vld [vmem:[%s559_s0 + $0x28] sm:$0xff] }
   0x6   :  { %176 = vmatpush.bf16.msra.mxu0 %v421_v1  ;;  %426 = vmatpush.bf16.msra.mxu1 %v421_v1  ;;  %v414_v15 = vld [vmem:[%s559_s0 + $0x38] sm:$0xff] }
   0x7   :  { %427 = vmatpush.bf16.msra.mxu2 %v421_v1  ;;  %428 = vmatpush.bf16.msra.mxu3 %v421_v1 }
   0xa   :  { %177 = vmatpush.bf16.msra.mxu0 %v420_v2  ;;  %429 = vmatpush.bf16.msra.mxu1 %v420_v2 }
   0xb   :  { %430 = vmatpush.bf16.msra.mxu2 %v420_v2  ;;  %431 = vmatpush.bf16.msra.mxu3 %v420_v2 }
   0xe   :  { %178 = vmatpush.bf16.msra.mxu0 %v419_v3  ;;  %432 = vmatpush.bf16.msra.mxu1 %v419_v3 }
   0xf   :  { %433 = vmatpush.bf16.msra.mxu2 %v419_v3  ;;  %434 = vmatpush.bf16.msra.mxu3 %v419_v3 }
  0x12   :  { %179 = vmatpush.bf16.msra.mxu0 %v418_v4  ;;  %435 = vmatpush.bf16.msra.mxu1 %v418_v4 }
  0x13   :  { %436 = vmatpush.bf16.msra.mxu2 %v418_v4  ;;  %437 = vmatpush.bf16.msra.mxu3 %v418_v4 }
  0x16   :  { %180 = vmatpush.bf16.msra.mxu0 %v417_v5  ;;  %438 = vmatpush.bf16.msra.mxu1 %v417_v5 }
  0x17   :  { %439 = vmatpush.bf16.msra.mxu2 %v417_v5  ;;  %440 = vmatpush.bf16.msra.mxu3 %v417_v5 }
  0x1a   :  { %181 = vmatpush.bf16.msra.mxu0 %v416_v6  ;;  %441 = vmatpush.bf16.msra.mxu1 %v416_v6 }
  0x1b   :  { %442 = vmatpush.bf16.msra.mxu2 %v416_v6  ;;  %443 = vmatpush.bf16.msra.mxu3 %v416_v6 }
  0x1e   :  { %182 = vmatpush.bf16.msra.mxu0 %v415_v7  ;;  %444 = vmatpush.bf16.msra.mxu1 %v415_v7 }
  0x1f   :  { %445 = vmatpush.bf16.msra.mxu2 %v415_v7  ;;  %446 = vmatpush.bf16.msra.mxu3 %v415_v7 }
  0x21   :  { %183 = vmatmul.bf16.vlgmr.msra.gmra.mxu0 %v407_v8  ;;  %193 = vmatmul.bf16.vlgmr.msra.gmra.mxu1 %v409_v9 }
  0x22   :  { %203 = vmatmul.bf16.vlgmr.msra.gmra.mxu2 %v411_v10  ;;  %213 = vmatmul.bf16.vlgmr.msra.gmra.mxu3 %v413_v11 }
  0x31   :  { %188 = vmatmul.bf16.gmra.mxu0 %v408_v12  ;;  %198 = vmatmul.bf16.gmra.mxu1 %v410_v13 }
  0x32   :  { %208 = vmatmul.bf16.gmra.mxu2 %v412_v14  ;;  %218 = vmatmul.bf16.gmra.mxu3 %v414_v15 }
  0x9e   :  { %v184_v16 = vpop.f32.mrf.mxu0  ;;  %v194_v17 = vpop.f32.mrf.mxu1 }
  0x9f   :  { %vm275_vm0 = vcmp.ge.f32.partialorder %v184_v16, 0.0  ;;  %v291_v18 = vmul.f32 0.2, %v184_v16  ;;  %vm279_vm1 = vcmp.ge.f32.partialorder %v194_v17, 0.0  ;;  %v295_v19 = vmul.f32 0.2, %v194_v17 }
  0xa1   :  { %v307_v20 = vsel %vm275_vm0, %v184_v16, %v291_v18  ;;  %v311_v21 = vsel %vm279_vm1, %v194_v17, %v295_v19 }
  0xa2   :  { %323 = vst [vmem:[%s560_s2] sm:$0xff] %v307_v20 }
  0xa3   :  { %327 = vst [vmem:[%s560_s2 + $0x20] sm:$0xff] %v311_v21 }
  0xa5   :  { %v204_v22 = vpop.f32.mrf.mxu2  ;;  %v214_v23 = vpop.f32.mrf.mxu3 }
  0xa6   :  { %vm283_vm2 = vcmp.ge.f32.partialorder %v204_v22, 0.0  ;;  %v299_v24 = vmul.f32 0.2, %v204_v22  ;;  %vm287_vm3 = vcmp.ge.f32.partialorder %v214_v23, 0.0  ;;  %v303_v25 = vmul.f32 0.2, %v214_v23  ;;  %v186_v26 = vpop.f32.mrf.mxu0  ;;  %v196_v27 = vpop.f32.mrf.mxu1 }
  0xa7   :  { %vm276_vm4 = vcmp.ge.f32.partialorder %v186_v26, 0.0  ;;  %v292_v28 = vmul.f32 0.2, %v186_v26  ;;  %vm280_vm5 = vcmp.ge.f32.partialorder %v196_v27, 0.0  ;;  %v296_v29 = vmul.f32 0.2, %v196_v27 }
  0xa8   :  { %v315_v30 = vsel %vm283_vm2, %v204_v22, %v299_v24  ;;  %v319_v31 = vsel %vm287_vm3, %v214_v23, %v303_v25 }
  0xa9   :  { %331 = vst [vmem:[%s560_s2 + $0x40] sm:$0xff] %v315_v30  ;;  %v308_v32 = vsel %vm276_vm4, %v186_v26, %v292_v28  ;;  %v312_v33 = vsel %vm280_vm5, %v196_v27, %v296_v29 }
  0xaa   :  { %335 = vst [vmem:[%s560_s2 + $0x60] sm:$0xff] %v319_v31 }
  0xab   :  { %324 = vst [vmem:[%s560_s2 + $0x8] sm:$0xff] %v308_v32 }
  0xac   :  { %328 = vst [vmem:[%s560_s2 + $0x28] sm:$0xff] %v312_v33 }
  0xad   :  { %v206_v34 = vpop.f32.mrf.mxu2  ;;  %v216_v35 = vpop.f32.mrf.mxu3 }
  0xae   :  { %vm284_vm6 = vcmp.ge.f32.partialorder %v206_v34, 0.0  ;;  %v300_v36 = vmul.f32 0.2, %v206_v34  ;;  %vm288_vm7 = vcmp.ge.f32.partialorder %v216_v35, 0.0  ;;  %v304_v37 = vmul.f32 0.2, %v216_v35  ;;  %v189_v38 = vpop.f32.mrf.mxu0  ;;  %v199_v39 = vpop.f32.mrf.mxu1 }
  0xaf   :  { %vm277_vm8 = vcmp.ge.f32.partialorder %v189_v38, 0.0  ;;  %v293_v40 = vmul.f32 0.2, %v189_v38  ;;  %vm281_vm9 = vcmp.ge.f32.partialorder %v199_v39, 0.0  ;;  %v297_v41 = vmul.f32 0.2, %v199_v39 }
  0xb0   :  { %v316_v42 = vsel %vm284_vm6, %v206_v34, %v300_v36  ;;  %v320_v43 = vsel %vm288_vm7, %v216_v35, %v304_v37 }
  0xb1   :  { %332 = vst [vmem:[%s560_s2 + $0x48] sm:$0xff] %v316_v42  ;;  %v309_v44 = vsel %vm277_vm8, %v189_v38, %v293_v40  ;;  %v313_v45 = vsel %vm281_vm9, %v199_v39, %v297_v41 }
  0xb2   :  { %336 = vst [vmem:[%s560_s2 + $0x68] sm:$0xff] %v320_v43 }
  0xb3   :  { %325 = vst [vmem:[%s560_s2 + $0x10] sm:$0xff] %v309_v44 }
  0xb4   :  { %329 = vst [vmem:[%s560_s2 + $0x30] sm:$0xff] %v313_v45 }
  0xb5   :  { %v209_v46 = vpop.f32.mrf.mxu2  ;;  %v219_v47 = vpop.f32.mrf.mxu3 }
  0xb6   :  { %vm285_vm10 = vcmp.ge.f32.partialorder %v209_v46, 0.0  ;;  %v301_v48 = vmul.f32 0.2, %v209_v46  ;;  %vm289_vm11 = vcmp.ge.f32.partialorder %v219_v47, 0.0  ;;  %v305_v49 = vmul.f32 0.2, %v219_v47  ;;  %v191_v50 = vpop.f32.mrf.mxu0  ;;  %v201_v51 = vpop.f32.mrf.mxu1 }
  0xb7   :  { %vm278_vm12 = vcmp.ge.f32.partialorder %v191_v50, 0.0  ;;  %v294_v52 = vmul.f32 0.2, %v191_v50  ;;  %vm282_vm13 = vcmp.ge.f32.partialorder %v201_v51, 0.0  ;;  %v298_v53 = vmul.f32 0.2, %v201_v51 }
  0xb8   :  { %v317_v54 = vsel %vm285_vm10, %v209_v46, %v301_v48  ;;  %v321_v55 = vsel %vm289_vm11, %v219_v47, %v305_v49 }
  0xb9   :  { %333 = vst [vmem:[%s560_s2 + $0x50] sm:$0xff] %v317_v54  ;;  %v310_v56 = vsel %vm278_vm12, %v191_v50, %v294_v52  ;;  %v314_v57 = vsel %vm282_vm13, %v201_v51, %v298_v53 }
  0xba   :  { %337 = vst [vmem:[%s560_s2 + $0x70] sm:$0xff] %v321_v55 }
  0xbb   :  { %326 = vst [vmem:[%s560_s2 + $0x18] sm:$0xff] %v310_v56 }
  0xbc   :  { %330 = vst [vmem:[%s560_s2 + $0x38] sm:$0xff] %v314_v57 }
  0xbd   :  { %v211_v58 = vpop.f32.mrf.mxu2  ;;  %v221_v59 = vpop.f32.mrf.mxu3 }
  0xbe   :  { %vm286_vm14 = vcmp.ge.f32.partialorder %v211_v58, 0.0  ;;  %v302_v60 = vmul.f32 0.2, %v211_v58  ;;  %vm290_vm15 = vcmp.ge.f32.partialorder %v221_v59, 0.0  ;;  %v306_v61 = vmul.f32 0.2, %v221_v59 }
  0xc0   :  { %v318_v62 = vsel %vm286_vm14, %v211_v58, %v302_v60  ;;  %v322_v63 = vsel %vm290_vm15, %v221_v59, %v306_v61 }
  0xc1   :  { %334 = vst [vmem:[%s560_s2 + $0x58] sm:$0xff] %v318_v62 }
  0xc2   :  { %338 = vst [vmem:[%s560_s2 + $0x78] sm:$0xff] %v322_v63 }

// kernel: forward.7
= control target key start
LH: loop header
LB: loop body
LE: loop exit
PB: predicated region body
PF: predicated region fallthrough
CT: control target
= control target key end

     0   :  { %s463_s1 = inlined_call_operand.vmem [shape: bf16[256,128], index: 1, kind: input, shape index: {}]   ;;  %s464_s0 = inlined_call_operand.vmem [shape: bf16[32,256], index: 0, kind: input, shape index: {}]   ;;  %s465_s2 = inlined_call_operand.vmem [shape: f32[32,128], index: 2, kind: output, shape index: {}]  }
   0x1   :  { %v339_v0 = vld [vmem:[%s463_s1 + $0x38] sm:$0xff]  ;;  %v338_v2 = vld [vmem:[%s463_s1 + $0x30] sm:$0xff]  ;;  %v337_v4 = vld [vmem:[%s463_s1 + $0x28] sm:$0xff] }
   0x2   :  { %v347_v1 = vld [vmem:[%s463_s1 + $0x78] sm:$0xff]  ;;  %175 = vmatpush.bf16.msra.mxu0 %v339_v0  ;;  %348 = vmatpush.bf16.msra.mxu2 %v339_v0  ;;  %v346_v3 = vld [vmem:[%s463_s1 + $0x70] sm:$0xff]  ;;  %v345_v5 = vld [vmem:[%s463_s1 + $0x68] sm:$0xff] }
   0x3   :  { %194 = vmatpush.bf16.msra.mxu1 %v347_v1  ;;  %356 = vmatpush.bf16.msra.mxu3 %v347_v1  ;;  %v336_v6 = vld [vmem:[%s463_s1 + $0x20] sm:$0xff]  ;;  %v335_v8 = vld [vmem:[%s463_s1 + $0x18] sm:$0xff]  ;;  %v334_v10 = vld [vmem:[%s463_s1 + $0x10] sm:$0xff] }
   0x4   :  { %v344_v7 = vld [vmem:[%s463_s1 + $0x60] sm:$0xff]  ;;  %v343_v9 = vld [vmem:[%s463_s1 + $0x58] sm:$0xff]  ;;  %v342_v11 = vld [vmem:[%s463_s1 + $0x50] sm:$0xff] }
   0x5   :  { %v333_v12 = vld [vmem:[%s463_s1 + $0x8] sm:$0xff]  ;;  %v332_v14 = vld [vmem:[%s463_s1] sm:$0xff]  ;;  %v258_v18 = vld [vmem:[%s464_s0 + $0x10] sm:$0xf] }
   0x6   :  { %176 = vmatpush.bf16.msra.mxu0 %v338_v2  ;;  %349 = vmatpush.bf16.msra.mxu2 %v338_v2  ;;  %v341_v13 = vld [vmem:[%s463_s1 + $0x48] sm:$0xff]  ;;  %v340_v15 = vld [vmem:[%s463_s1 + $0x40] sm:$0xff]  ;;  %v331_v19 = vld [vmem:[%s464_s0 + $0x14] sm:$0xf0] }
   0x7   :  { %195 = vmatpush.bf16.msra.mxu1 %v346_v3  ;;  %357 = vmatpush.bf16.msra.mxu3 %v346_v3  ;;  %v250_v16 = vld [vmem:[%s464_s0] sm:$0xf]  ;;  %v329_v17 = vld [vmem:[%s464_s0 + $0x4] sm:$0xf0]  ;;  %v328_v20 = vld [vmem:[%s464_s0 + $0x4] sm:$0xf]  ;;  %v259_v25 = vor.u32 %v331_v19, %v258_v18 }
   0x8   :  { %v252_v21 = vld [vmem:[%s464_s0 + $0x8] sm:$0xf0]  ;;  %v330_v22 = vld [vmem:[%s464_s0 + $0x14] sm:$0xf]  ;;  %v260_v23 = vld [vmem:[%s464_s0 + $0x18] sm:$0xf0]  ;;  %v251_v24 = vor.u32 %v329_v17, %v250_v16 }
   0x9   :  { %v255_v26 = vor.u32 %v328_v20, %v252_v21  ;;  %v263_v27 = vor.u32 %v330_v22, %v260_v23 }
   0xa   :  { %177 = vmatpush.bf16.msra.mxu0 %v337_v4  ;;  %350 = vmatpush.bf16.msra.mxu2 %v337_v4 }
   0xb   :  { %196 = vmatpush.bf16.msra.mxu1 %v345_v5  ;;  %358 = vmatpush.bf16.msra.mxu3 %v345_v5 }
   0xe   :  { %178 = vmatpush.bf16.msra.mxu0 %v336_v6  ;;  %351 = vmatpush.bf16.msra.mxu2 %v336_v6 }
   0xf   :  { %197 = vmatpush.bf16.msra.mxu1 %v344_v7  ;;  %359 = vmatpush.bf16.msra.mxu3 %v344_v7 }
  0x12   :  { %179 = vmatpush.bf16.msra.mxu0 %v335_v8  ;;  %352 = vmatpush.bf16.msra.mxu2 %v335_v8 }
  0x13   :  { %198 = vmatpush.bf16.msra.mxu1 %v343_v9  ;;  %360 = vmatpush.bf16.msra.mxu3 %v343_v9 }
  0x16   :  { %180 = vmatpush.bf16.msra.mxu0 %v334_v10  ;;  %353 = vmatpush.bf16.msra.mxu2 %v334_v10 }
  0x17   :  { %199 = vmatpush.bf16.msra.mxu1 %v342_v11  ;;  %361 = vmatpush.bf16.msra.mxu3 %v342_v11 }
  0x1a   :  { %181 = vmatpush.bf16.msra.mxu0 %v333_v12  ;;  %354 = vmatpush.bf16.msra.mxu2 %v333_v12 }
  0x1b   :  { %200 = vmatpush.bf16.msra.mxu1 %v341_v13  ;;  %362 = vmatpush.bf16.msra.mxu3 %v341_v13 }
  0x1e   :  { %182 = vmatpush.bf16.msra.mxu0 %v332_v14  ;;  %355 = vmatpush.bf16.msra.mxu2 %v332_v14 }
  0x1f   :  { %201 = vmatpush.bf16.msra.mxu1 %v340_v15  ;;  %363 = vmatpush.bf16.msra.mxu3 %v340_v15 }
  0x21   :  { %183 = vmatmul.bf16.vlgmr.msra.gmra.mxu0 %v251_v24  ;;  %188 = vmatmul.bf16.vlgmr.msra.gmra.mxu2 %v259_v25 }
  0x22   :  { %202 = vmatmul.bf16.vlgmr.msra.gmra.mxu1 %v255_v26  ;;  %207 = vmatmul.bf16.vlgmr.msra.gmra.mxu3 %v263_v27 }
  0x9e   :  { %v184_v28 = vpop.f32.mrf.mxu0 }
  0x9f   :  { %v203_v29 = vpop.f32.mrf.mxu1 }
  0xa0   :  { %v204_v30 = vadd.f32 %v203_v29, %v184_v28 }
  0xa2   :  { %vm228_vm0 = vcmp.ge.f32.partialorder %v204_v30, 0.0  ;;  %v232_v31 = vmul.f32 0.2, %v204_v30 }
  0xa4   :  { %v236_v32 = vsel %vm228_vm0, %v204_v30, %v232_v31  ;;  %v189_v33 = vpop.f32.mrf.mxu2 }
  0xa5   :  { %240 = vst [vmem:[%s465_s2] sm:$0xff] %v236_v32  ;;  %v208_v34 = vpop.f32.mrf.mxu3 }
  0xa6   :  { %v209_v35 = vadd.f32 %v208_v34, %v189_v33  ;;  %v186_v36 = vpop.f32.mrf.mxu0 }
  0xa7   :  { %v205_v37 = vpop.f32.mrf.mxu1 }
  0xa8   :  { %vm230_vm1 = vcmp.ge.f32.partialorder %v209_v35, 0.0  ;;  %v234_v38 = vmul.f32 0.2, %v209_v35  ;;  %v206_v39 = vadd.f32 %v205_v37, %v186_v36 }
  0xaa   :  { %v238_v40 = vsel %vm230_vm1, %v209_v35, %v234_v38  ;;  %vm229_vm2 = vcmp.ge.f32.partialorder %v206_v39, 0.0  ;;  %v233_v41 = vmul.f32 0.2, %v206_v39 }
  0xab   :  { %242 = vst [vmem:[%s465_s2 + $0x10] sm:$0xff] %v238_v40 }
  0xac   :  { %v237_v42 = vsel %vm229_vm2, %v206_v39, %v233_v41  ;;  %v191_v43 = vpop.f32.mrf.mxu2 }
  0xad   :  { %241 = vst [vmem:[%s465_s2 + $0x8] sm:$0xff] %v237_v42  ;;  %v210_v44 = vpop.f32.mrf.mxu3 }
  0xae   :  { %v211_v45 = vadd.f32 %v210_v44, %v191_v43 }
  0xb0   :  { %vm231_vm3 = vcmp.ge.f32.partialorder %v211_v45, 0.0  ;;  %v235_v46 = vmul.f32 0.2, %v211_v45 }
  0xb2   :  { %v239_v47 = vsel %vm231_vm3, %v211_v45, %v235_v46 }
  0xb3   :  { %243 = vst [vmem:[%s465_s2 + $0x18] sm:$0xff] %v239_v47 }

// kernel: forward.8
= control target key start
LH: loop header
LB: loop body
LE: loop exit
PB: predicated region body
PF: predicated region fallthrough
CT: control target
= control target key end

     0   :  { %s747_s1 = inlined_call_operand.vmem [shape: bf16[512,128], index: 1, kind: input, shape index: {}]   ;;  %s748_s0 = inlined_call_operand.vmem [shape: bf16[24,512], index: 0, kind: input, shape index: {}]   ;;  %s749_s2 = inlined_call_operand.vmem [shape: f32[24,128], index: 2, kind: output, shape index: {}]  }
   0x1   :  { %v572_v0 = vld [vmem:[%s747_s1 + $0x38] sm:$0xff]  ;;  %v571_v4 = vld [vmem:[%s747_s1 + $0x30] sm:$0xff]  ;;  %v570_v8 = vld [vmem:[%s747_s1 + $0x28] sm:$0xff] }
   0x2   :  { %v580_v1 = vld [vmem:[%s747_s1 + $0x78] sm:$0xff]  ;;  %317 = vmatpush.bf16.msra.mxu0 %v572_v0  ;;  %v579_v5 = vld [vmem:[%s747_s1 + $0x70] sm:$0xff]  ;;  %v578_v9 = vld [vmem:[%s747_s1 + $0x68] sm:$0xff] }
   0x3   :  { %v588_v2 = vld [vmem:[%s747_s1 + $0xb8] sm:$0xff]  ;;  %335 = vmatpush.bf16.msra.mxu1 %v580_v1  ;;  %v587_v6 = vld [vmem:[%s747_s1 + $0xb0] sm:$0xff]  ;;  %v586_v10 = vld [vmem:[%s747_s1 + $0xa8] sm:$0xff] }
   0x4   :  { %v596_v3 = vld [vmem:[%s747_s1 + $0xf8] sm:$0xff]  ;;  %353 = vmatpush.bf16.msra.mxu2 %v588_v2  ;;  %v595_v7 = vld [vmem:[%s747_s1 + $0xf0] sm:$0xff]  ;;  %v594_v11 = vld [vmem:[%s747_s1 + $0xe8] sm:$0xff] }
   0x5   :  { %371 = vmatpush.bf16.msra.mxu3 %v596_v3  ;;  %v569_v12 = vld [vmem:[%s747_s1 + $0x20] sm:$0xff]  ;;  %v568_v16 = vld [vmem:[%s747_s1 + $0x18] sm:$0xff]  ;;  %v567_v20 = vld [vmem:[%s747_s1 + $0x10] sm:$0xff] }
   0x6   :  { %318 = vmatpush.bf16.msra.mxu0 %v571_v4  ;;  %v577_v13 = vld [vmem:[%s747_s1 + $0x60] sm:$0xff]  ;;  %v576_v17 = vld [vmem:[%s747_s1 + $0x58] sm:$0xff]  ;;  %v575_v21 = vld [vmem:[%s747_s1 + $0x50] sm:$0xff] }
   0x7   :  { %336 = vmatpush.bf16.msra.mxu1 %v579_v5  ;;  %v585_v14 = vld [vmem:[%s747_s1 + $0xa0] sm:$0xff]  ;;  %v584_v18 = vld [vmem:[%s747_s1 + $0x98] sm:$0xff]  ;;  %v583_v22 = vld [vmem:[%s747_s1 + $0x90] sm:$0xff] }
   0x8   :  { %354 = vmatpush.bf16.msra.mxu2 %v587_v6  ;;  %v593_v15 = vld [vmem:[%s747_s1 + $0xe0] sm:$0xff]  ;;  %v592_v19 = vld [vmem:[%s747_s1 + $0xd8] sm:$0xff]  ;;  %v591_v23 = vld [vmem:[%s747_s1 + $0xd0] sm:$0xff] }
   0x9   :  { %372 = vmatpush.bf16.msra.mxu3 %v595_v7  ;;  %v566_v24 = vld [vmem:[%s747_s1 + $0x8] sm:$0xff]  ;;  %v565_v28 = vld [vmem:[%s747_s1] sm:$0xff]  ;;  %v563_v33 = vld [vmem:[%s748_s0 + $0xc] sm:$0xf0] }
   0xa   :  { %319 = vmatpush.bf16.msra.mxu0 %v570_v8  ;;  %v574_v25 = vld [vmem:[%s747_s1 + $0x48] sm:$0xff]  ;;  %v573_v29 = vld [vmem:[%s747_s1 + $0x40] sm:$0xff]  ;;  %v421_v35 = vld [vmem:[%s748_s0 + $0x10] sm:$0xf0] }
   0xb   :  { %337 = vmatpush.bf16.msra.mxu1 %v578_v9  ;;  %v582_v26 = vld [vmem:[%s747_s1 + $0x88] sm:$0xff]  ;;  %v581_v30 = vld [vmem:[%s747_s1 + $0x80] sm:$0xff]  ;;  %v564_v37 = vld [vmem:[%s748_s0 + $0x14] sm:$0xf0] }
   0xc   :  { %355 = vmatpush.bf16.msra.mxu2 %v586_v10  ;;  %v590_v27 = vld [vmem:[%s747_s1 + $0xc8] sm:$0xff]  ;;  %v589_v31 = vld [vmem:[%s747_s1 + $0xc0] sm:$0xff]  ;;  %v429_v39 = vld [vmem:[%s748_s0 + $0x18] sm:$0xf0] }
   0xd   :  { %373 = vmatpush.bf16.msra.mxu3 %v594_v11  ;;  %v419_v32 = vld [vmem:[%s748_s0] sm:$0xf]  ;;  %v561_v34 = vld [vmem:[%s748_s0 + $0x4] sm:$0xf]  ;;  %v427_v36 = vld [vmem:[%s748_s0 + $0x8] sm:$0xf] }
   0xe   :  { %320 = vmatpush.bf16.msra.mxu0 %v569_v12  ;;  %v562_v38 = vld [vmem:[%s748_s0 + $0xc] sm:$0xf]  ;;  %v420_v40 = vor.u32 %v563_v33, %v419_v32  ;;  %v424_v41 = vor.u32 %v561_v34, %v421_v35  ;;  %v428_v42 = vor.u32 %v564_v37, %v427_v36  ;;  %v25_v44 = vld [vmem:[%s748_s0 + $0x20] sm:$0xff] }
   0xf   :  { %338 = vmatpush.bf16.msra.mxu1 %v577_v13  ;;  %v432_v43 = vor.u32 %v562_v38, %v429_v39  ;;  %v26_v45 = vld [vmem:[%s748_s0 + $0x28] sm:$0xff]  ;;  %v105_v46 = vunpack.c.l.b16 %v25_v44  ;;  %v106_v47 = vunpack.c.h.b16 %v25_v44 }
  0x10   :  { %356 = vmatpush.bf16.msra.mxu2 %v585_v14  ;;  %v107_v48 = vunpack.c.l.b16 %v26_v45  ;;  %v108_v49 = vunpack.c.h.b16 %v26_v45 }
  0x11   :  { %374 = vmatpush.bf16.msra.mxu3 %v593_v15  ;;  %v113_v50 = vpack.c.b16 %v105_v46, %v105_v46  ;;  %v114_v51 = vpack.c.b16 %v106_v47, %v106_v47 }
  0x12   :  { %321 = vmatpush.bf16.msra.mxu0 %v568_v16  ;;  %v115_v52 = vpack.c.b16 %v107_v48, %v107_v48  ;;  %v116_v53 = vpack.c.b16 %v108_v49, %v108_v49 }
  0x13   :  { %339 = vmatpush.bf16.msra.mxu1 %v576_v17 }
  0x14   :  { %357 = vmatpush.bf16.msra.mxu2 %v584_v18 }
  0x15   :  { %375 = vmatpush.bf16.msra.mxu3 %v592_v19 }
  0x16   :  { %322 = vmatpush.bf16.msra.mxu0 %v567_v20 }
  0x17   :  { %340 = vmatpush.bf16.msra.mxu1 %v575_v21 }
  0x18   :  { %358 = vmatpush.bf16.msra.mxu2 %v583_v22 }
  0x19   :  { %376 = vmatpush.bf16.msra.mxu3 %v591_v23 }
  0x1a   :  { %323 = vmatpush.bf16.msra.mxu0 %v566_v24 }
  0x1b   :  { %341 = vmatpush.bf16.msra.mxu1 %v574_v25 }
  0x1c   :  { %359 = vmatpush.bf16.msra.mxu2 %v582_v26 }
  0x1d   :  { %377 = vmatpush.bf16.msra.mxu3 %v590_v27 }
  0x1e   :  { %324 = vmatpush.bf16.msra.mxu0 %v565_v28 }
  0x1f   :  { %342 = vmatpush.bf16.msra.mxu1 %v573_v29 }
  0x20   :  { %360 = vmatpush.bf16.msra.mxu2 %v581_v30 }
  0x21   :  { %378 = vmatpush.bf16.msra.mxu3 %v589_v31  ;;  %325 = vmatmul.bf16.vlgmr.msra.gmra.mxu0 %v420_v40 }
  0x22   :  { %343 = vmatmul.bf16.vlgmr.msra.gmra.mxu1 %v424_v41 }
  0x23   :  { %361 = vmatmul.bf16.vlgmr.msra.gmra.mxu2 %v428_v42 }
  0x24   :  { %379 = vmatmul.bf16.vlgmr.msra.gmra.mxu3 %v432_v43 }
  0x31   :  { %330 = vmatmul.bf16.gmra.mxu0 %v113_v50 }
  0x32   :  { %348 = vmatmul.bf16.gmra.mxu1 %v114_v51 }
  0x33   :  { %366 = vmatmul.bf16.gmra.mxu2 %v115_v52 }
  0x34   :  { %384 = vmatmul.bf16.gmra.mxu3 %v116_v53 }
  0x9e   :  { %v326_v54 = vpop.f32.mrf.mxu0 }
  0x9f   :  { %v344_v55 = vpop.f32.mrf.mxu1 }
  0xa0   :  { %v345_v56 = vadd.f32 %v344_v55, %v326_v54 }
  0xa6   :  { %v362_v57 = vpop.f32.mrf.mxu2  ;;  %v328_v60 = vpop.f32.mrf.mxu0 }
  0xa7   :  { %v380_v58 = vpop.f32.mrf.mxu3  ;;  %v363_v59 = vadd.f32 %v362_v57, %v345_v56  ;;  %v346_v61 = vpop.f32.mrf.mxu1 }
  0xa8   :  { %v347_v1 = vadd.f32 %v346_v61, %v328_v60 }
  0xa9   :  { %v381_v62 = vadd.f32 %v380_v58, %v363_v59 }
  0xab   :  { %vm401_vm0 = vcmp.ge.f32.partialorder %v381_v62, 0.0  ;;  %v404_v63 = vmul.f32 0.2, %v381_v62 }
  0xad   :  { %v407_v0 = vsel %vm401_vm0, %v381_v62, %v404_v63 }
  0xae   :  { %410 = vst [vmem:[%s749_s2] sm:$0xff] %v407_v0  ;;  %v364_v2 = vpop.f32.mrf.mxu2  ;;  %v331_v5 = vpop.f32.mrf.mxu0 }
  0xaf   :  { %v382_v3 = vpop.f32.mrf.mxu3  ;;  %v365_v4 = vadd.f32 %v364_v2, %v347_v1  ;;  %v349_v6 = vpop.f32.mrf.mxu1 }
  0xb0   :  { %v350_v9 = vadd.f32 %v349_v6, %v331_v5 }
  0xb1   :  { %v383_v7 = vadd.f32 %v382_v3, %v365_v4 }
  0xb3   :  { %vm402_vm1 = vcmp.ge.f32.partialorder %v383_v7, 0.0  ;;  %v405_v8 = vmul.f32 0.2, %v383_v7 }
  0xb5   :  { %v408_v10 = vsel %vm402_vm1, %v383_v7, %v405_v8 }
  0xb6   :  { %411 = vst [vmem:[%s749_s2 + $0x8] sm:$0xff] %v408_v10  ;;  %v367_v11 = vpop.f32.mrf.mxu2  ;;  %v333_v14 = vpop.f32.mrf.mxu0 }
  0xb7   :  { %v385_v12 = vpop.f32.mrf.mxu3  ;;  %v368_v13 = vadd.f32 %v367_v11, %v350_v9  ;;  %v351_v15 = vpop.f32.mrf.mxu1 }
  0xb9   :  { %v386_v16 = vadd.f32 %v385_v12, %v368_v13 }
  0xbb   :  { %vm403_vm2 = vcmp.ge.f32.partialorder %v386_v16, 0.0  ;;  %v406_v17 = vmul.f32 0.2, %v386_v16 }
  0xbd   :  { %v409_v18 = vsel %vm403_vm2, %v386_v16, %v406_v17 }
  0xbe   :  { %412 = vst [vmem:[%s749_s2 + $0x10] sm:$0xff] %v409_v18  ;;  %v369_v19 = vpop.f32.mrf.mxu2 }
  0xbf   :  { %v387_v20 = vpop.f32.mrf.mxu3 }

// kernel: forward.9
= control target key start
LH: loop header
LB: loop body
LE: loop exit
PB: predicated region body
PF: predicated region fallthrough
CT: control target
= control target key end

     0   :  { %s910_s9 = smov 0   ;;  %s912_s10 = smov 0   ;;  %s990_s0 = inlined_call_operand.vmem [shape: bf16[8,1024], index: 0, kind: input, shape index: {}]   ;;  %s991_s1 = inlined_call_operand.vmem [shape: bf16[1024,128], index: 1, kind: input, shape index: {}]   ;;  %s992_s2 = inlined_call_operand.vmem [shape: f32[8,128], index: 2, kind: output, shape index: {}]  }
   0x1   :  { %s914_s11 = smov 0  }
   0x2 LB: > { %s24_s12 = sadd.s32 1, %s888_s10  ;;  %p671_p0 = scmp.ge.s32.totalorder %s892_s11, 1  ;;  %s892_s11 = sphi %s914_s11, %s12_s11   ;;  %s888_s10 = sphi %s912_s10, %s994_s10   ;;  %s884_s9 = sphi %s910_s9, %s993_s9  }
   0x3   : > { %p25_p1 = scmp.ge.s32.totalorder %s24_s12, 2  ;;  %p156_p2 = scmp.lt.s32.totalorder %s892_s11, 3 }
   0x5   : > { %s996_s12 = smov (%p25_p1, %s24_s12), 0  ;;  %p157_p3 = pnand %p671_p0, %p156_p2 }
   0x6   : > { %s672_s13 = sshll.u32 (!%p157_p3), %s884_s9, 2  ;;  %s674_s14 = sshll.u32 (!%p157_p3), %s884_s9, 6 }
   0x7   : > { %160 = sbr.rel (%p157_p3) target bundleno = 233 (0xe9), region = 28  ;;  %p195_p4 = scmp.lt.s32.totalorder (!%p157_p3), %s672_s13, 7 }
   0x8   : > { %p203_p5 = scmp.lt.s32.totalorder (!%p157_p3), %s674_s14, 127  ;;  %p676_p6 = scmp.ne.s32.totalorder (!%p157_p3), %s884_s9, 0 }
   0xc   : > { %s998_s13 = smov (!%p195_p4, %s672_s13), 7  ;;  %s1000_s14 = smov (!%p203_p5, %s674_s14), 127 }
   0xd   : > { %s673_s15 = sshll.u32 %s998_s13, 2  ;;  %s675_s19 = sshll.u32 %s1000_s14, 2 }
   0xe   : > { %s935_s18 = scalar_lea.vmem %s990_s0, %s673_s15  ;;  %s940_s22 = scalar_lea.vmem %s991_s1, %s675_s19 }
   0xf   : > { %221 = sbr.rel (%p676_p6) target bundleno = 22 (0x16), region = 32 }
  0x14   : > { %v894_v0 = vmov 0.0  }
  0x15   : > { %222 = vst [vmem:[#allocation2] sm:$0xff] %v894_v0 }
  0x16 PF: > { %v816_v1 = vld [vmem:[%s940_s22 + $0x38] sm:$0xff]  ;;  %v815_v5 = vld [vmem:[%s940_s22 + $0x30] sm:$0xff]  ;;  %v814_v9 = vld [vmem:[%s940_s22 + $0x28] sm:$0xff]  ;;  %p805_p7 = scmp.ne.s32.totalorder %s884_s9, 1 }
  0x17   : > { %v824_v2 = vld [vmem:[%s940_s22 + $0x78] sm:$0xff]  ;;  %496 = vmatpush.bf16.msra.mxu0 %v816_v1  ;;  %v823_v6 = vld [vmem:[%s940_s22 + $0x70] sm:$0xff]  ;;  %v822_v10 = vld [vmem:[%s940_s22 + $0x68] sm:$0xff] }
  0x18   : > { %v832_v3 = vld [vmem:[%s940_s22 + $0xb8] sm:$0xff]  ;;  %509 = vmatpush.bf16.msra.mxu1 %v824_v2  ;;  %v831_v7 = vld [vmem:[%s940_s22 + $0xb0] sm:$0xff]  ;;  %v830_v11 = vld [vmem:[%s940_s22 + $0xa8] sm:$0xff] }
  0x19   : > { %v840_v4 = vld [vmem:[%s940_s22 + $0xf8] sm:$0xff]  ;;  %522 = vmatpush.bf16.msra.mxu2 %v832_v3  ;;  %v839_v8 = vld [vmem:[%s940_s22 + $0xf0] sm:$0xff]  ;;  %v838_v12 = vld [vmem:[%s940_s22 + $0xe8] sm:$0xff] }
  0x1a   : > { %535 = vmatpush.bf16.msra.mxu3 %v840_v4  ;;  %v813_v13 = vld [vmem:[%s940_s22 + $0x20] sm:$0xff]  ;;  %v812_v17 = vld [vmem:[%s940_s22 + $0x18] sm:$0xff]  ;;  %v811_v21 = vld [vmem:[%s940_s22 + $0x10] sm:$0xff] }
  0x1b   : > { %497 = vmatpush.bf16.msra.mxu0 %v815_v5  ;;  %v821_v14 = vld [vmem:[%s940_s22 + $0x60] sm:$0xff]  ;;  %v820_v18 = vld [vmem:[%s940_s22 + $0x58] sm:$0xff]  ;;  %v819_v22 = vld [vmem:[%s940_s22 + $0x50] sm:$0xff] }
  0x1c   : > { %510 = vmatpush.bf16.msra.mxu1 %v823_v6  ;;  %v829_v15 = vld [vmem:[%s940_s22 + $0xa0] sm:$0xff]  ;;  %v828_v19 = vld [vmem:[%s940_s22 + $0x98] sm:$0xff]  ;;  %v827_v23 = vld [vmem:[%s940_s22 + $0x90] sm:$0xff] }
  0x1d   : > { %523 = vmatpush.bf16.msra.mxu2 %v831_v7  ;;  %v837_v16 = vld [vmem:[%s940_s22 + $0xe0] sm:$0xff]  ;;  %v836_v20 = vld [vmem:[%s940_s22 + $0xd8] sm:$0xff]  ;;  %v835_v24 = vld [vmem:[%s940_s22 + $0xd0] sm:$0xff] }
  0x1e   : > { %536 = vmatpush.bf16.msra.mxu3 %v839_v8  ;;  %v810_v25 = vld [vmem:[%s940_s22 + $0x8] sm:$0xff]  ;;  %v224_v27 = vld [vmem:[%s935_s18] sm:$0xff] }
  0x1f   : > { %498 = vmatpush.bf16.msra.mxu0 %v814_v9  ;;  %v818_v26 = vld [vmem:[%s940_s22 + $0x48] sm:$0xff]  ;;  %v292_v31 = vunpack.c.l.b16 %v224_v27  ;;  %v293_v32 = vunpack.c.h.b16 %v224_v27  ;;  %v809_v33 = vld [vmem:[%s940_s22] sm:$0xff] }
  0x20   : > { %511 = vmatpush.bf16.msra.mxu1 %v822_v10  ;;  %v826_v28 = vld [vmem:[%s940_s22 + $0x88] sm:$0xff]  ;;  %v817_v34 = vld [vmem:[%s940_s22 + $0x40] sm:$0xff] }
  0x21   : > { %524 = vmatpush.bf16.msra.mxu2 %v830_v11  ;;  %v834_v29 = vld [vmem:[%s940_s22 + $0xc8] sm:$0xff]  ;;  %v825_v37 = vld [vmem:[%s940_s22 + $0x80] sm:$0xff]  ;;  %v296_v39 = vpack.c.b16 %v292_v31, %v292_v31  ;;  %v297_v40 = vpack.c.b16 %v293_v32, %v293_v32 }
  0x22   : > { %537 = vmatpush.bf16.msra.mxu3 %v838_v12  ;;  %v225_v30 = vld [vmem:[%s935_s18 + $0x8] sm:$0xff]  ;;  %v833_v38 = vld [vmem:[%s940_s22 + $0xc0] sm:$0xff] }
  0x23   : > { %499 = vmatpush.bf16.msra.mxu0 %v813_v13  ;;  %v294_v35 = vunpack.c.l.b16 %v225_v30  ;;  %v295_v36 = vunpack.c.h.b16 %v225_v30  ;;  %v223_v51 = vld [vmem:[#allocation2] sm:$0xff] }
  0x24   : > { %512 = vmatpush.bf16.msra.mxu1 %v821_v14 }
  0x25   : > { %525 = vmatpush.bf16.msra.mxu2 %v829_v15  ;;  %v298_v41 = vpack.c.b16 %v294_v35, %v294_v35  ;;  %v299_v42 = vpack.c.b16 %v295_v36, %v295_v36 }
  0x26   : > { %538 = vmatpush.bf16.msra.mxu3 %v837_v16 }
  0x27   : > { %500 = vmatpush.bf16.msra.mxu0 %v812_v17 }
  0x28   : > { %513 = vmatpush.bf16.msra.mxu1 %v820_v18 }
  0x29   : > { %526 = vmatpush.bf16.msra.mxu2 %v828_v19 }
  0x2a   : > { %539 = vmatpush.bf16.msra.mxu3 %v836_v20 }
  0x2b   : > { %501 = vmatpush.bf16.msra.mxu0 %v811_v21 }
  0x2c   : > { %514 = vmatpush.bf16.msra.mxu1 %v819_v22 }
  0x2d   : > { %527 = vmatpush.bf16.msra.mxu2 %v827_v23 }
  0x2e   : > { %540 = vmatpush.bf16.msra.mxu3 %v835_v24 }
  0x2f   : > { %502 = vmatpush.bf16.msra.mxu0 %v810_v25 }
  0x30   : > { %515 = vmatpush.bf16.msra.mxu1 %v818_v26 }
  0x31   : > { %528 = vmatpush.bf16.msra.mxu2 %v826_v28 }
  0x32   : > { %541 = vmatpush.bf16.msra.mxu3 %v834_v29 }
  0x33   : > { %503 = vmatpush.bf16.msra.mxu0 %v809_v33 }
  0x34   : > { %516 = vmatpush.bf16.msra.mxu1 %v817_v34 }
  0x35   : > { %529 = vmatpush.bf16.msra.mxu2 %v825_v37 }
  0x36   : > { %542 = vmatpush.bf16.msra.mxu3 %v833_v38  ;;  %504 = vmatmul.bf16.vlgmr.msra.gmra.mxu0 %v296_v39 }
  0x37   : > { %517 = vmatmul.bf16.vlgmr.msra.gmra.mxu1 %v297_v40 }
  0x38   : > { %530 = vmatmul.bf16.vlgmr.msra.gmra.mxu2 %v298_v41 }
  0x39   : > { %543 = vmatmul.bf16.vlgmr.msra.gmra.mxu3 %v299_v42 }
  0xb3   : > { %v505_v43 = vpop.f32.mrf.mxu0 }
  0xb4   : > { %v518_v44 = vpop.f32.mrf.mxu1 }
  0xb5   : > { %v519_v45 = vadd.f32 %v518_v44, %v505_v43 }
  0xbb   : > { %v531_v46 = vpop.f32.mrf.mxu2  ;;  %v507_v49 = vpop.f32.mrf.mxu0 }
  0xbc   : > { %v544_v47 = vpop.f32.mrf.mxu3  ;;  %v532_v48 = vadd.f32 %v531_v46, %v519_v45  ;;  %v520_v50 = vpop.f32.mrf.mxu1 }
  0xbe   : > { %v545_v52 = vadd.f32 %v544_v47, %v532_v48 }
  0xc0   : > { %v548_v53 = vadd.f32 %v545_v52, %v223_v51  ;;  %553 = sbr.rel (%p805_p7) target bundleno = 233 (0xe9), region = 36 }
  0xc2   : > { %549 = vst [vmem:[#allocation2] sm:$0xff] %v548_v53 }
  0xc3   : > { %v533_v54 = vpop.f32.mrf.mxu2 }
  0xc4   : > { %v546_v55 = vpop.f32.mrf.mxu3 }
  0xc9   : > { %v554_v56 = vld [vmem:[#allocation2] sm:$0xff] }
  0xca   : > { %v555_v57 = vsub.f32 0.0, %v554_v56 }
  0xcc   : > { %v556_v58 = vmul.f32 1.442695, %v555_v57 }
  0xce   : > { %866 = vpow2.f32 %v556_v58 }
  0xd4   : > { %v867_v59 = vpop.eup %866 }
  0xd5   : > { %v558_v60 = vadd.f32 1.0, %v867_v59 }
  0xd7   : > { %868 = vrcp.f32 %v558_v60  ;;  %v570_v63 = vand.u32 2147483648, %v558_v60  ;;  %vm564_vm0 = vweird.f32 %v558_v60  ;;  %v568_v1 = vand.u32 2147483647, %v558_v60 }
  0xd9   : > { %v571_v3 = vor.u32 1.1754944e-38, %v570_v63  ;;  %vm569_vm3 = vcmp.eq.f32.partialorder %v568_v1, 8.507059e+37 }
  0xdd   : > { %v869_v61 = vpop.eup %868 }
  0xde   : > { %v560_v62 = vmul.f32 %v869_v61, %v558_v60  ;;  %vm565_vm1 = vweird.f32 %v869_v61 }
  0xdf   : > { %vm566_vm2 = vmor %vm564_vm0, %vm565_vm1 }
  0xe0   : > { %v561_v0 = vsub.f32 1.0, %v560_v62 }
  0xe2   : > { %v562_v2 = vmul.f32 %v869_v61, %v561_v0 }
  0xe4   : > { %v563_v4 = vadd.f32 %v869_v61, %v562_v2 }
  0xe6   : > { %v567_v5 = vsel %vm566_vm2, %v869_v61, %v563_v4 }
  0xe7   : > { %v572_v6 = vsel %vm569_vm3, %v571_v3, %v567_v5 }
  0xe8   : > { %574 = vst [vmem:[%s992_s2] sm:$0xff] %v572_v6 }
  0xe9 PF: > { %s12_s11 = sadd.s32 1, %s892_s11   ;;  %s993_s9 = smov %s888_s10 }
  0xea   : > { %p9_p8 = scmp.ge.s32.totalorder %s12_s11, 4   ;;  %s994_s10 = smov %s996_s12 }
  0xec   :  { %11 = sbr.rel (!%p9_p8) target bundleno = 2 (0x2), region = 69 }

</bundles_post_ra>
